<compile_context>
chip_gen: v6e
topology: v6e:2x2x1
jax: 0.10.0
libtpu: 0.0.40
codegen_flags: <defaults>
</compile_context>

<pallas_src>
import functools

import jax
import jax.numpy as jnp
from jax.experimental import pallas as pl
from jax.experimental.pallas import tpu as pltpu


# ---------------------------------------------------------------------------
# Path 1: fully fused, VMEM-resident weight stack.
# Best when the whole (L, D, D) stack fits comfortably in VMEM (small/medium
# D).  One pallas_call, no per-layer HBM round trips for the activation,
# weights DMA'd once (constant index_map) and reused by every batch tile.
# ---------------------------------------------------------------------------
def _fused_mlp_kernel(x_ref, w_ref, b_ref, o_ref):
    """One (tm, D) batch tile through all L fused Linear+ReLU layers.

    x_ref: (tm, D)     activation tile
    w_ref: (L, D, D)   all weights, resident in VMEM across the whole grid
    b_ref: (L, 1, D)   all biases
    o_ref: (tm, D)     output tile
    """
    n_layers = w_ref.shape[0]
    # Carry the activation in the weight dtype (bf16 when bf16 weights are
    # used): a single cast per layer after the f32 bias+ReLU, instead of a
    # full-tile f32->bf16 cast pass in front of every matmul.
    h = x_ref[...].astype(w_ref.dtype)
    y = None
    for layer in range(n_layers):  # static unroll over the 10 layers
        y = jnp.dot(h, w_ref[layer], preferred_element_type=jnp.float32)
        y = jnp.maximum(y + b_ref[layer].astype(jnp.float32), 0.0)  # f32 bias+ReLU
        h = y.astype(w_ref.dtype)
    o_ref[...] = y.astype(o_ref.dtype)  # final layer written straight from f32


@functools.partial(jax.jit, static_argnames=("tm",))
def fused_mlp(x, w_stack, b_stack, *, tm):
    """y = relu(... relu(relu(x @ W0 + b0) @ W1 + b1) ... @ W9 + b9)"""
    M, D = x.shape
    L, D_in, D_out = w_stack.shape
    assert D_in == D and D_out == D, "fused path requires in == hidden == out"
    assert b_stack.shape == (L, 1, D)
    # TODO(synk): ragged batch sizes need a padded/masked last tile.
    assert M % tm == 0 and tm % 8 == 0 and D % 128 == 0

    n_blocks = M // tm
    # Megacore split only pays off once each TensorCore gets MXU-meaningful
    # work; at tiny per-block row counts it just doubles weight HBM traffic.
    batch_sem = "parallel" if (n_blocks > 1 and tm >= 128) else "arbitrary"

    return pl.pallas_call(
        _fused_mlp_kernel,
        out_shape=jax.ShapeDtypeStruct((M, D), x.dtype),
        grid_spec=pltpu.PrefetchScalarGridSpec(
            num_scalar_prefetch=0,
            grid=(n_blocks,),
            in_specs=[
                # Activation tile: walks the batch.
                pl.BlockSpec((tm, D), lambda i: (i, 0)),
                # Weights / biases: constant index_map -> DMA'd once, resident
                # in VMEM for the whole grid.  (If D is scaled up, add
                # pipeline_mode=pl.Buffered(1) here so the never-changing
                # block is not double-buffered, and raise vmem_limit_bytes.)
                pl.BlockSpec((L, D, D), lambda i: (0, 0, 0)),
                pl.BlockSpec((L, 1, D), lambda i: (0, 0, 0)),
            ],
            out_specs=pl.BlockSpec((tm, D), lambda i: (i, 0)),
        ),
        compiler_params=pltpu.CompilerParams(
            dimension_semantics=(batch_sem,),
        ),
    )(x, w_stack, b_stack)


# ---------------------------------------------------------------------------
# Path 2: per-layer weight streaming.
# Trailing "arbitrary" layer grid axis; only one layer's (D, D) weight block
# is live per step (auto double-buffered, so its DMA overlaps the previous
# layer's matmul); the activation is carried across layer steps in VMEM
# scratch and the output tile is written only at the last layer (P3 pattern).
# This is the structure required to scale toward the real dim=5120 model.
# ---------------------------------------------------------------------------
def _streaming_mlp_kernel(x_ref, w_ref, b_ref, o_ref, h_ref):
    """Grid = (batch_block, layer).  w_ref/b_ref hold ONE layer's params."""
    layer = pl.program_id(1)

    @pl.when(layer == 0)
    def _():
        h_ref[...] = x_ref[...].astype(h_ref.dtype)

    y = jnp.dot(h_ref[...], w_ref[...], preferred_element_type=jnp.float32)
    y = jnp.maximum(y + b_ref[...].astype(jnp.float32), 0.0)
    h_ref[...] = y.astype(h_ref.dtype)

    @pl.when(layer == pl.num_programs(1) - 1)
    def _():
        o_ref[...] = y.astype(o_ref.dtype)


@functools.partial(jax.jit, static_argnames=("tm",))
def streaming_mlp(x, w_stack, b_stack, *, tm):
    M, D = x.shape
    L = w_stack.shape[0]
    assert w_stack.shape == (L, D, D) and b_stack.shape == (L, 1, D)
    assert M % tm == 0 and tm % 8 == 0 and D % 128 == 0

    n_blocks = M // tm
    batch_sem = "parallel" if (n_blocks > 1 and tm >= 128) else "arbitrary"

    # TODO(synk): at the real dim=5120 a single bf16 (D, D) layer is ~52 MiB;
    # on v7x (64 MiB VMEM) the layer axis additionally needs K/N weight tiling
    # (extra 'arbitrary' grid axes + an f32 accumulator scratch).
    return pl.pallas_call(
        _streaming_mlp_kernel,
        out_shape=jax.ShapeDtypeStruct((M, D), x.dtype),
        grid_spec=pltpu.PrefetchScalarGridSpec(
            num_scalar_prefetch=0,
            grid=(n_blocks, L),  # layer axis last (reduction-like)
            in_specs=[
                pl.BlockSpec((tm, D), lambda i, l: (i, 0)),
                pl.BlockSpec((None, D, D), lambda i, l: (l, 0, 0)),
                pl.BlockSpec((None, 1, D), lambda i, l: (l, 0, 0)),
            ],
            out_specs=pl.BlockSpec((tm, D), lambda i, l: (i, 0)),
            scratch_shapes=[pltpu.VMEM((tm, D), w_stack.dtype)],
        ),
        compiler_params=pltpu.CompilerParams(
            dimension_semantics=(batch_sem, "arbitrary"),
        ),
    )(x, w_stack, b_stack)


# ---------------------------------------------------------------------------
# Helpers / reference
# ---------------------------------------------------------------------------
def pick_tm(M, cap=256):
    """Largest multiple of 8 that divides M, capped (128 on v5e, 256 v6e/v7x)."""
    assert M % 8 == 0
    best = 8
    t = 8
    while t <= min(M, cap):
        if M % t == 0:
            best = t
        t += 8
    return best


def init_params(key, dim, n_layers=10, param_dtype=jnp.bfloat16):
    """PyTorch-style uniform(-1/sqrt(fan_in), +1/sqrt(fan_in)) init.

    W stored as (in, out) -> (L, dim, dim); b -> (L, 1, dim)."""
    ws, bs = [], []
    bound = 1.0 / float(dim) ** 0.5
    for _ in range(n_layers):
        key, kw, kb = jax.random.split(key, 3)
        ws.append(jax.random.uniform(kw, (dim, dim), jnp.float32, -bound, bound))
        bs.append(jax.random.uniform(kb, (1, dim), jnp.float32, -bound, bound))
    return (jnp.stack(ws).astype(param_dtype), jnp.stack(bs).astype(param_dtype))


def reference_forward(x, w_stack, b_stack):
    """Pure-JAX reference with the SAME casting policy as the kernels:
    activations carried in the param dtype, matmul accumulation / bias / ReLU
    in f32 (mirrors mixed-precision semantics of TestModel.forward)."""
    carry_dtype = w_stack.dtype
    h = x.astype(carry_dtype)
    y = None
    for layer in range(w_stack.shape[0]):
        y = jnp.dot(h, w_stack[layer], preferred_element_type=jnp.float32)
        y = jnp.maximum(y + b_stack[layer].astype(jnp.float32), 0.0)
        h = y.astype(carry_dtype)
    return y.astype(x.dtype)


if __name__ == "__main__":
    # Small shapes consistent with the module structure (in = hidden = out,
    # 10 layers; scaled down from 5120 -> 256).
    batch = 16
    dim = 256
    n_layers = 10  # linear1 + 4*2 hidden layers + linear6

    key = jax.random.PRNGKey(0)
    key, kx = jax.random.split(key)
    x = jax.random.normal(kx, (batch, dim), jnp.float32)

    # bf16 weights actually enabled (halves weight DMA, 2x MXU on v6e/v7x);
    # all accumulation / bias / ReLU stays f32 inside the kernels.
    w_stack, b_stack = init_params(key, dim, n_layers, param_dtype=jnp.bfloat16)

    y_ref = reference_forward(x, w_stack, b_stack)

    # Path 1: fused resident-weight kernel. tm=16 -> grid=(1,): one MXU matmul
    # per layer, no megacore split (avoids 2x weight HBM reads at tiny batch).
    tm = pick_tm(batch)  # 16 here; 128/256 for realistic training batches
    y = fused_mlp(x, w_stack, b_stack, tm=tm)
    jax.block_until_ready(y)
    assert y.shape == (batch, dim)
    assert bool(jnp.all(y >= 0.0))
    assert bool(jnp.allclose(y, y_ref, rtol=2e-2, atol=2e-2))

    # Path 2: streaming kernel (the large-D structure), validated at small
    # shape with 2 batch blocks x 10 layer steps.
    y2 = streaming_mlp(x, w_stack, b_stack, tm=8)
    jax.block_until_ready(y2)
    assert y2.shape == (batch, dim)
    assert bool(jnp.all(y2 >= 0.0))
    assert bool(jnp.allclose(y2, y_ref, rtol=2e-2, atol=2e-2))

    print("KERNEL_OK")
</pallas_src>

<mosaic_0001>
module attributes {stable_mosaic.version = 11 : i64} {
  func.func @_fused_mlp_kernel(%arg0: i32, %arg1: memref<16x256xf32, #tpu.memory_space<vmem>>, %arg2: memref<10x256x256xbf16, #tpu.memory_space<vmem>>, %arg3: memref<10x1x256xbf16, #tpu.memory_space<vmem>>, %arg4: memref<16x256xf32, #tpu.memory_space<vmem>>) attributes {dimension_semantics = [#tpu.dimension_semantics<arbitrary>], iteration_bounds = array<i64: 1>, scalar_prefetch = 0 : i64, scratch_operands = 0 : i64, tpu.core_type = #tpu.core_type<tc>, window_params = [{transform_indices = @transform_0, window_bounds = array<i64: 16, 256>}, {pipeline_mode = #tpu.pipeline_mode<synchronous>, transform_indices = @transform_1, window_bounds = array<i64: 10, 256, 256>}, {pipeline_mode = #tpu.pipeline_mode<synchronous>, transform_indices = @transform_2, window_bounds = array<i64: 10, 1, 256>}, {transform_indices = @transform_3, window_bounds = array<i64: 16, 256>}]} {
    %c0 = arith.constant 0 : index
    %c0_0 = arith.constant 0 : index
    %0 = vector.load %arg1[%c0, %c0_0] : memref<16x256xf32, #tpu.memory_space<vmem>>, vector<16x256xf32>
    %1 = arith.truncf %0 : vector<16x256xf32> to vector<16x256xbf16>
    %c0_1 = arith.constant 0 : index
    %c0_2 = arith.constant 0 : index
    %c0_3 = arith.constant 0 : index
    %2 = vector.load %arg2[%c0_1, %c0_2, %c0_3] : memref<10x256x256xbf16, #tpu.memory_space<vmem>>, vector<1x256x256xbf16>
    %3 = vector.shape_cast %2 : vector<1x256x256xbf16> to vector<256x256xbf16>
    %cst = arith.constant dense<0.000000e+00> : vector<16x256xf32>
    %4 = tpu.matmul %1, %3, %cst {dimension_numbers = #tpu.dot_dimension_numbers<[1], [0], [0], [1], [0, 0, 1, 1], [], []>} : vector<16x256xbf16>, vector<256x256xbf16>, vector<16x256xf32> -> vector<16x256xf32>
    %c0_4 = arith.constant 0 : index
    %c0_5 = arith.constant 0 : index
    %c0_6 = arith.constant 0 : index
    %5 = vector.load %arg3[%c0_4, %c0_5, %c0_6] : memref<10x1x256xbf16, #tpu.memory_space<vmem>>, vector<1x1x256xbf16>
    %6 = vector.shape_cast %5 : vector<1x1x256xbf16> to vector<1x256xbf16>
    %7 = arith.extf %6 : vector<1x256xbf16> to vector<1x256xf32>
    %8 = vector.broadcast %7 : vector<1x256xf32> to vector<16x256xf32>
    %9 = arith.addf %4, %8 : vector<16x256xf32>
    %cst_7 = arith.constant 0.000000e+00 : f32
    %10 = vector.broadcast %cst_7 : f32 to vector<16x256xf32>
    %11 = arith.maximumf %9, %10 : vector<16x256xf32>
    %12 = arith.truncf %11 : vector<16x256xf32> to vector<16x256xbf16>
    %c1 = arith.constant 1 : index
    %c0_8 = arith.constant 0 : index
    %c0_9 = arith.constant 0 : index
    %13 = vector.load %arg2[%c1, %c0_8, %c0_9] : memref<10x256x256xbf16, #tpu.memory_space<vmem>>, vector<1x256x256xbf16>
    %14 = vector.shape_cast %13 : vector<1x256x256xbf16> to vector<256x256xbf16>
    %cst_10 = arith.constant dense<0.000000e+00> : vector<16x256xf32>
    %15 = tpu.matmul %12, %14, %cst_10 {dimension_numbers = #tpu.dot_dimension_numbers<[1], [0], [0], [1], [0, 0, 1, 1], [], []>} : vector<16x256xbf16>, vector<256x256xbf16>, vector<16x256xf32> -> vector<16x256xf32>
    %c1_11 = arith.constant 1 : index
    %c0_12 = arith.constant 0 : index
    %c0_13 = arith.constant 0 : index
    %16 = vector.load %arg3[%c1_11, %c0_12, %c0_13] : memref<10x1x256xbf16, #tpu.memory_space<vmem>>, vector<1x1x256xbf16>
    %17 = vector.shape_cast %16 : vector<1x1x256xbf16> to vector<1x256xbf16>
    %18 = arith.extf %17 : vector<1x256xbf16> to vector<1x256xf32>
    %19 = vector.broadcast %18 : vector<1x256xf32> to vector<16x256xf32>
    %20 = arith.addf %15, %19 : vector<16x256xf32>
    %cst_14 = arith.constant 0.000000e+00 : f32
    %21 = vector.broadcast %cst_14 : f32 to vector<16x256xf32>
    %22 = arith.maximumf %20, %21 : vector<16x256xf32>
    %23 = arith.truncf %22 : vector<16x256xf32> to vector<16x256xbf16>
    %c2 = arith.constant 2 : index
    %c0_15 = arith.constant 0 : index
    %c0_16 = arith.constant 0 : index
    %24 = vector.load %arg2[%c2, %c0_15, %c0_16] : memref<10x256x256xbf16, #tpu.memory_space<vmem>>, vector<1x256x256xbf16>
    %25 = vector.shape_cast %24 : vector<1x256x256xbf16> to vector<256x256xbf16>
    %cst_17 = arith.constant dense<0.000000e+00> : vector<16x256xf32>
    %26 = tpu.matmul %23, %25, %cst_17 {dimension_numbers = #tpu.dot_dimension_numbers<[1], [0], [0], [1], [0, 0, 1, 1], [], []>} : vector<16x256xbf16>, vector<256x256xbf16>, vector<16x256xf32> -> vector<16x256xf32>
    %c2_18 = arith.constant 2 : index
    %c0_19 = arith.constant 0 : index
    %c0_20 = arith.constant 0 : index
    %27 = vector.load %arg3[%c2_18, %c0_19, %c0_20] : memref<10x1x256xbf16, #tpu.memory_space<vmem>>, vector<1x1x256xbf16>
    %28 = vector.shape_cast %27 : vector<1x1x256xbf16> to vector<1x256xbf16>
    %29 = arith.extf %28 : vector<1x256xbf16> to vector<1x256xf32>
    %30 = vector.broadcast %29 : vector<1x256xf32> to vector<16x256xf32>
    %31 = arith.addf %26, %30 : vector<16x256xf32>
    %cst_21 = arith.constant 0.000000e+00 : f32
    %32 = vector.broadcast %cst_21 : f32 to vector<16x256xf32>
    %33 = arith.maximumf %31, %32 : vector<16x256xf32>
    %34 = arith.truncf %33 : vector<16x256xf32> to vector<16x256xbf16>
    %c3 = arith.constant 3 : index
    %c0_22 = arith.constant 0 : index
    %c0_23 = arith.constant 0 : index
    %35 = vector.load %arg2[%c3, %c0_22, %c0_23] : memref<10x256x256xbf16, #tpu.memory_space<vmem>>, vector<1x256x256xbf16>
    %36 = vector.shape_cast %35 : vector<1x256x256xbf16> to vector<256x256xbf16>
    %cst_24 = arith.constant dense<0.000000e+00> : vector<16x256xf32>
    %37 = tpu.matmul %34, %36, %cst_24 {dimension_numbers = #tpu.dot_dimension_numbers<[1], [0], [0], [1], [0, 0, 1, 1], [], []>} : vector<16x256xbf16>, vector<256x256xbf16>, vector<16x256xf32> -> vector<16x256xf32>
    %c3_25 = arith.constant 3 : index
    %c0_26 = arith.constant 0 : index
    %c0_27 = arith.constant 0 : index
    %38 = vector.load %arg3[%c3_25, %c0_26, %c0_27] : memref<10x1x256xbf16, #tpu.memory_space<vmem>>, vector<1x1x256xbf16>
    %39 = vector.shape_cast %38 : vector<1x1x256xbf16> to vector<1x256xbf16>
    %40 = arith.extf %39 : vector<1x256xbf16> to vector<1x256xf32>
    %41 = vector.broadcast %40 : vector<1x256xf32> to vector<16x256xf32>
    %42 = arith.addf %37, %41 : vector<16x256xf32>
    %cst_28 = arith.constant 0.000000e+00 : f32
    %43 = vector.broadcast %cst_28 : f32 to vector<16x256xf32>
    %44 = arith.maximumf %42, %43 : vector<16x256xf32>
    %45 = arith.truncf %44 : vector<16x256xf32> to vector<16x256xbf16>
    %c4 = arith.constant 4 : index
    %c0_29 = arith.constant 0 : index
    %c0_30 = arith.constant 0 : index
    %46 = vector.load %arg2[%c4, %c0_29, %c0_30] : memref<10x256x256xbf16, #tpu.memory_space<vmem>>, vector<1x256x256xbf16>
    %47 = vector.shape_cast %46 : vector<1x256x256xbf16> to vector<256x256xbf16>
    %cst_31 = arith.constant dense<0.000000e+00> : vector<16x256xf32>
    %48 = tpu.matmul %45, %47, %cst_31 {dimension_numbers = #tpu.dot_dimension_numbers<[1], [0], [0], [1], [0, 0, 1, 1], [], []>} : vector<16x256xbf16>, vector<256x256xbf16>, vector<16x256xf32> -> vector<16x256xf32>
    %c4_32 = arith.constant 4 : index
    %c0_33 = arith.constant 0 : index
    %c0_34 = arith.constant 0 : index
    %49 = vector.load %arg3[%c4_32, %c0_33, %c0_34] : memref<10x1x256xbf16, #tpu.memory_space<vmem>>, vector<1x1x256xbf16>
    %50 = vector.shape_cast %49 : vector<1x1x256xbf16> to vector<1x256xbf16>
    %51 = arith.extf %50 : vector<1x256xbf16> to vector<1x256xf32>
    %52 = vector.broadcast %51 : vector<1x256xf32> to vector<16x256xf32>
    %53 = arith.addf %48, %52 : vector<16x256xf32>
    %cst_35 = arith.constant 0.000000e+00 : f32
    %54 = vector.broadcast %cst_35 : f32 to vector<16x256xf32>
    %55 = arith.maximumf %53, %54 : vector<16x256xf32>
    %56 = arith.truncf %55 : vector<16x256xf32> to vector<16x256xbf16>
    %c5 = arith.constant 5 : index
    %c0_36 = arith.constant 0 : index
    %c0_37 = arith.constant 0 : index
    %57 = vector.load %arg2[%c5, %c0_36, %c0_37] : memref<10x256x256xbf16, #tpu.memory_space<vmem>>, vector<1x256x256xbf16>
    %58 = vector.shape_cast %57 : vector<1x256x256xbf16> to vector<256x256xbf16>
    %cst_38 = arith.constant dense<0.000000e+00> : vector<16x256xf32>
    %59 = tpu.matmul %56, %58, %cst_38 {dimension_numbers = #tpu.dot_dimension_numbers<[1], [0], [0], [1], [0, 0, 1, 1], [], []>} : vector<16x256xbf16>, vector<256x256xbf16>, vector<16x256xf32> -> vector<16x256xf32>
    %c5_39 = arith.constant 5 : index
    %c0_40 = arith.constant 0 : index
    %c0_41 = arith.constant 0 : index
    %60 = vector.load %arg3[%c5_39, %c0_40, %c0_41] : memref<10x1x256xbf16, #tpu.memory_space<vmem>>, vector<1x1x256xbf16>
    %61 = vector.shape_cast %60 : vector<1x1x256xbf16> to vector<1x256xbf16>
    %62 = arith.extf %61 : vector<1x256xbf16> to vector<1x256xf32>
    %63 = vector.broadcast %62 : vector<1x256xf32> to vector<16x256xf32>
    %64 = arith.addf %59, %63 : vector<16x256xf32>
    %cst_42 = arith.constant 0.000000e+00 : f32
    %65 = vector.broadcast %cst_42 : f32 to vector<16x256xf32>
    %66 = arith.maximumf %64, %65 : vector<16x256xf32>
    %67 = arith.truncf %66 : vector<16x256xf32> to vector<16x256xbf16>
    %c6 = arith.constant 6 : index
    %c0_43 = arith.constant 0 : index
    %c0_44 = arith.constant 0 : index
    %68 = vector.load %arg2[%c6, %c0_43, %c0_44] : memref<10x256x256xbf16, #tpu.memory_space<vmem>>, vector<1x256x256xbf16>
    %69 = vector.shape_cast %68 : vector<1x256x256xbf16> to vector<256x256xbf16>
    %cst_45 = arith.constant dense<0.000000e+00> : vector<16x256xf32>
    %70 = tpu.matmul %67, %69, %cst_45 {dimension_numbers = #tpu.dot_dimension_numbers<[1], [0], [0], [1], [0, 0, 1, 1], [], []>} : vector<16x256xbf16>, vector<256x256xbf16>, vector<16x256xf32> -> vector<16x256xf32>
    %c6_46 = arith.constant 6 : index
    %c0_47 = arith.constant 0 : index
    %c0_48 = arith.constant 0 : index
    %71 = vector.load %arg3[%c6_46, %c0_47, %c0_48] : memref<10x1x256xbf16, #tpu.memory_space<vmem>>, vector<1x1x256xbf16>
    %72 = vector.shape_cast %71 : vector<1x1x256xbf16> to vector<1x256xbf16>
    %73 = arith.extf %72 : vector<1x256xbf16> to vector<1x256xf32>
    %74 = vector.broadcast %73 : vector<1x256xf32> to vector<16x256xf32>
    %75 = arith.addf %70, %74 : vector<16x256xf32>
    %cst_49 = arith.constant 0.000000e+00 : f32
    %76 = vector.broadcast %cst_49 : f32 to vector<16x256xf32>
    %77 = arith.maximumf %75, %76 : vector<16x256xf32>
    %78 = arith.truncf %77 : vector<16x256xf32> to vector<16x256xbf16>
    %c7 = arith.constant 7 : index
    %c0_50 = arith.constant 0 : index
    %c0_51 = arith.constant 0 : index
    %79 = vector.load %arg2[%c7, %c0_50, %c0_51] : memref<10x256x256xbf16, #tpu.memory_space<vmem>>, vector<1x256x256xbf16>
    %80 = vector.shape_cast %79 : vector<1x256x256xbf16> to vector<256x256xbf16>
    %cst_52 = arith.constant dense<0.000000e+00> : vector<16x256xf32>
    %81 = tpu.matmul %78, %80, %cst_52 {dimension_numbers = #tpu.dot_dimension_numbers<[1], [0], [0], [1], [0, 0, 1, 1], [], []>} : vector<16x256xbf16>, vector<256x256xbf16>, vector<16x256xf32> -> vector<16x256xf32>
    %c7_53 = arith.constant 7 : index
    %c0_54 = arith.constant 0 : index
    %c0_55 = arith.constant 0 : index
    %82 = vector.load %arg3[%c7_53, %c0_54, %c0_55] : memref<10x1x256xbf16, #tpu.memory_space<vmem>>, vector<1x1x256xbf16>
    %83 = vector.shape_cast %82 : vector<1x1x256xbf16> to vector<1x256xbf16>
    %84 = arith.extf %83 : vector<1x256xbf16> to vector<1x256xf32>
    %85 = vector.broadcast %84 : vector<1x256xf32> to vector<16x256xf32>
    %86 = arith.addf %81, %85 : vector<16x256xf32>
    %cst_56 = arith.constant 0.000000e+00 : f32
    %87 = vector.broadcast %cst_56 : f32 to vector<16x256xf32>
    %88 = arith.maximumf %86, %87 : vector<16x256xf32>
    %89 = arith.truncf %88 : vector<16x256xf32> to vector<16x256xbf16>
    %c8 = arith.constant 8 : index
    %c0_57 = arith.constant 0 : index
    %c0_58 = arith.constant 0 : index
    %90 = vector.load %arg2[%c8, %c0_57, %c0_58] : memref<10x256x256xbf16, #tpu.memory_space<vmem>>, vector<1x256x256xbf16>
    %91 = vector.shape_cast %90 : vector<1x256x256xbf16> to vector<256x256xbf16>
    %cst_59 = arith.constant dense<0.000000e+00> : vector<16x256xf32>
    %92 = tpu.matmul %89, %91, %cst_59 {dimension_numbers = #tpu.dot_dimension_numbers<[1], [0], [0], [1], [0, 0, 1, 1], [], []>} : vector<16x256xbf16>, vector<256x256xbf16>, vector<16x256xf32> -> vector<16x256xf32>
    %c8_60 = arith.constant 8 : index
    %c0_61 = arith.constant 0 : index
    %c0_62 = arith.constant 0 : index
    %93 = vector.load %arg3[%c8_60, %c0_61, %c0_62] : memref<10x1x256xbf16, #tpu.memory_space<vmem>>, vector<1x1x256xbf16>
    %94 = vector.shape_cast %93 : vector<1x1x256xbf16> to vector<1x256xbf16>
    %95 = arith.extf %94 : vector<1x256xbf16> to vector<1x256xf32>
    %96 = vector.broadcast %95 : vector<1x256xf32> to vector<16x256xf32>
    %97 = arith.addf %92, %96 : vector<16x256xf32>
    %cst_63 = arith.constant 0.000000e+00 : f32
    %98 = vector.broadcast %cst_63 : f32 to vector<16x256xf32>
    %99 = arith.maximumf %97, %98 : vector<16x256xf32>
    %100 = arith.truncf %99 : vector<16x256xf32> to vector<16x256xbf16>
    %c9 = arith.constant 9 : index
    %c0_64 = arith.constant 0 : index
    %c0_65 = arith.constant 0 : index
    %101 = vector.load %arg2[%c9, %c0_64, %c0_65] : memref<10x256x256xbf16, #tpu.memory_space<vmem>>, vector<1x256x256xbf16>
    %102 = vector.shape_cast %101 : vector<1x256x256xbf16> to vector<256x256xbf16>
    %cst_66 = arith.constant dense<0.000000e+00> : vector<16x256xf32>
    %103 = tpu.matmul %100, %102, %cst_66 {dimension_numbers = #tpu.dot_dimension_numbers<[1], [0], [0], [1], [0, 0, 1, 1], [], []>} : vector<16x256xbf16>, vector<256x256xbf16>, vector<16x256xf32> -> vector<16x256xf32>
    %c9_67 = arith.constant 9 : index
    %c0_68 = arith.constant 0 : index
    %c0_69 = arith.constant 0 : index
    %104 = vector.load %arg3[%c9_67, %c0_68, %c0_69] : memref<10x1x256xbf16, #tpu.memory_space<vmem>>, vector<1x1x256xbf16>
    %105 = vector.shape_cast %104 : vector<1x1x256xbf16> to vector<1x256xbf16>
    %106 = arith.extf %105 : vector<1x256xbf16> to vector<1x256xf32>
    %107 = vector.broadcast %106 : vector<1x256xf32> to vector<16x256xf32>
    %108 = arith.addf %103, %107 : vector<16x256xf32>
    %cst_70 = arith.constant 0.000000e+00 : f32
    %109 = vector.broadcast %cst_70 : f32 to vector<16x256xf32>
    %110 = arith.maximumf %108, %109 : vector<16x256xf32>
    %c0_71 = arith.constant 0 : index
    %c0_72 = arith.constant 0 : index
    %111 = vector.load %arg4[%c0_71, %c0_72] : memref<16x256xf32, #tpu.memory_space<vmem>>, vector<16x256xf32>
    tpu.vector_store %arg4[%c0_71, %c0_72], %110 {strides = array<i32>} : memref<16x256xf32, #tpu.memory_space<vmem>>, vector<16x256xf32>,
    return
  }
  func.func @transform_0(%arg0: i32) -> (i32, i32) {
    %c0_i32 = arith.constant 0 : i32
    %c0_i32_0 = arith.constant 0 : i32
    return %arg0, %c0_i32 : i32, i32
  }
  func.func @transform_1(%arg0: i32) -> (i32, i32, i32) {
    %c0_i32 = arith.constant 0 : i32
    %c0_i32_0 = arith.constant 0 : i32
    %c0_i32_1 = arith.constant 0 : i32
    %c0_i32_2 = arith.constant 0 : i32
    return %c0_i32, %c0_i32_0, %c0_i32_1 : i32, i32, i32
  }
  func.func @transform_2(%arg0: i32) -> (i32, i32, i32) {
    %c0_i32 = arith.constant 0 : i32
    %c0_i32_0 = arith.constant 0 : i32
    %c0_i32_1 = arith.constant 0 : i32
    %c0_i32_2 = arith.constant 0 : i32
    return %c0_i32, %c0_i32_0, %c0_i32_1 : i32, i32, i32
  }
  func.func @transform_3(%arg0: i32) -> (i32, i32) {
    %c0_i32 = arith.constant 0 : i32
    %c0_i32_0 = arith.constant 0 : i32
    return %arg0, %c0_i32 : i32, i32
  }
}

</mosaic_0001>

<bundles_post_ra>
// kernel: fused_mlp.1
= control target key start
LH: loop header
LB: loop body
LE: loop exit
PB: predicated region body
PF: predicated region fallthrough
CT: control target
= control target key end

     0   :  { %8 = vsyncpa [#allocation3], 0  ;;  %s3705_s0 = inlined_call_operand.hbm [shape: f32[16,256], index: 0, kind: input, shape index: {}]   ;;  %s3706_s1 = inlined_call_operand.hbm [shape: bf16[10,256,256], index: 1, kind: input, shape index: {}]   ;;  %s3707_s2 = inlined_call_operand.vmem [shape: bf16[10,1,256], index: 2, kind: input, shape index: {}]   ;;  %s3708_s3 = inlined_call_operand.hbm [shape: f32[16,256], index: 3, kind: output, shape index: {}]  }
   0x1   :  { %9 = vsyncpa [#allocation6], 0 }
   0x2   :  { %10 = vsyncpa [#allocation4], 0  ;;  %s3589_s12 = smov [#allocation2]  }
   0x3   :  { %s16_s13 = sshll.u32 %s3589_s12, 4  ;;  %s17_s13 = int_to_ptr.vmem [resolvable:$true] %s16_s13 }
   0x4   :  { %s3531_s14 = scalar_lea.vmem %s17_s13, 512  ;;  %p3536_p1 = scmp.lt.s32.totalorder %s17_s13, %s17_s13 }
   0x5   :  { %p3532_p0 = scmp.ne.s32.totalorder %s17_s13, %s3531_s14  ;;  %p3537_p2 = scmp.lt.s32.totalorder %s3531_s14, %s3531_s14 }
   0x7   :  { %p3538_p3 = por %p3537_p2, %p3536_p1 }
   0x9   :  { %p3539_p4 = pnand %p3538_p3, %p3532_p0 }
   0xb   :  { %3542 = shalt.err (!%p3539_p4)
}
   0xc   :  { %s3590_s15 = smov 256   ;;  %s3591_s16 = smov 16  }
   0xd   :  { %22 = dma.hbm_to_vmem [thread:$0]  %s3705_s0, 512, %s17_s13, [#allocation3], %s3590_s15, %s3590_s15, %s3591_s16  }
   0xe   :  { %s3592_s19 = smov [#allocation5]  }
   0xf   :  { %s28_s20 = sshll.u32 %s3592_s19, 4  ;;  %s29_s20 = int_to_ptr.vmem [resolvable:$true] %s28_s20 }
  0x10   :  { %s3551_s21 = scalar_lea.vmem %s29_s20, 40960  ;;  %p3556_p6 = scmp.lt.s32.totalorder %s29_s20, %s29_s20 }
  0x11   :  { %p3552_p5 = scmp.ne.s32.totalorder %s29_s20, %s3551_s21  ;;  %p3557_p7 = scmp.lt.s32.totalorder %s3551_s21, %s3551_s21 }
  0x13   :  { %p3558_p8 = por %p3557_p7, %p3556_p6 }
  0x15   :  { %p3559_p9 = pnand %p3558_p8, %p3552_p5 }
  0x17   :  { %3562 = shalt.err (!%p3559_p9)
}
  0x18   :  { %s3593_s22 = smov 128   ;;  %s3594_s23 = smov 8  }
  0x19   :  { %34 = dma.hbm_to_vmem [thread:$0]  %s3706_s1, 40960, %s29_s20, [#allocation6], %s3593_s22, %s3593_s22, %s3594_s23  }
  0x1a   :  { %3583 = dma.done.wait [#allocation3], 512  }
  0x1b   :  { %3584 = vsyncadd [#allocation3], 4294966784 }
  0x1c   :  { %3585 = dma.done.wait [#allocation6], 40960  }
  0x1d   :  { %3586 = vsyncadd [#allocation6], 4294926336  ;;  %v3043_v0 = vld [vmem:[#allocation5 + $0x74] ss:$8 sps:$4 sm:$0xff]   ;;  %v3045_v1 = vld [vmem:[#allocation5 + $0x70] ss:$8 sps:$4 sm:$0xff]  }
  0x1e   :  { %262 = vmatprep.subr.bf16.mxu0 %v3043_v0  ;;  %v3046_v2 = vld [vmem:[#allocation5 + $0x64] ss:$8 sps:$4 sm:$0xff]   ;;  %v3048_v3 = vld [vmem:[#allocation5 + $0x60] ss:$8 sps:$4 sm:$0xff]   ;;  %v3049_v4 = vld [vmem:[#allocation5 + $0x54] ss:$8 sps:$4 sm:$0xff]  }
  0x1f   :  { %263 = vmatpush1.bf16.msra.mxu0 %v3045_v1  ;;  %v3051_v5 = vld [vmem:[#allocation5 + $0x50] ss:$8 sps:$4 sm:$0xff]   ;;  %v3052_v6 = vld [vmem:[#allocation5 + $0x44] ss:$8 sps:$4 sm:$0xff]   ;;  %v3054_v7 = vld [vmem:[#allocation5 + $0x40] ss:$8 sps:$4 sm:$0xff]  }
  0x20   :  { %264 = vmatprep.subr.bf16.mxu0 %v3046_v2  ;;  %v3055_v8 = vld [vmem:[#allocation5 + $0x34] ss:$8 sps:$4 sm:$0xff]   ;;  %v3057_v9 = vld [vmem:[#allocation5 + $0x30] ss:$8 sps:$4 sm:$0xff]   ;;  %v3058_v10 = vld [vmem:[#allocation5 + $0x24] ss:$8 sps:$4 sm:$0xff]  }
  0x21   :  { %v3060_v11 = vld [vmem:[#allocation5 + $0x20] ss:$8 sps:$4 sm:$0xff]   ;;  %v3061_v12 = vld [vmem:[#allocation5 + $0x14] ss:$8 sps:$4 sm:$0xff]   ;;  %v3063_v15 = vld [vmem:[#allocation5 + $0x10] ss:$8 sps:$4 sm:$0xff]  }
  0x22   :  { %v44_v13 = vld [vmem:[#allocation2 + $0x8] sm:$0xff]  ;;  %v46_v14 = vld [vmem:[#allocation2 + $0x18] sm:$0xff]  ;;  %v43_v55 = vld [vmem:[#allocation2] sm:$0xff] }
  0x23   :  { %265 = vmatpush1.bf16.msra.mxu0 %v3048_v3  ;;  %v3064_v16 = vld [vmem:[#allocation5 + $0x4] ss:$8 sps:$4 sm:$0xff]   ;;  %v48_v17 = vpack.c.bf16 %v46_v14, %v44_v13  ;;  %v3091_v18 = vld [vmem:[#allocation5 + $0x174] ss:$8 sps:$4 sm:$0xff]   ;;  %v3093_v19 = vld [vmem:[#allocation5 + $0x170] ss:$8 sps:$4 sm:$0xff]  }
  0x24   :  { %266 = vmatprep.subr.bf16.mxu0 %v3049_v4  ;;  %v3094_v20 = vld [vmem:[#allocation5 + $0x164] ss:$8 sps:$4 sm:$0xff]   ;;  %526 = vmatprep.subr.bf16.mxu1 %v3091_v18  ;;  %v3096_v21 = vld [vmem:[#allocation5 + $0x160] ss:$8 sps:$4 sm:$0xff]   ;;  %v3097_v23 = vld [vmem:[#allocation5 + $0x154] ss:$8 sps:$4 sm:$0xff]  }
  0x25   :  { %294 = vmatprep.mubr.bf16.mxu0 %v48_v17  ;;  %527 = vmatpush1.bf16.msra.mxu1 %v3093_v19  ;;  %v3066_v22 = vld [vmem:[#allocation5] ss:$8 sps:$4 sm:$0xff]   ;;  %v3067_v24 = vld [vmem:[#allocation5 + $0xf4] ss:$8 sps:$4 sm:$0xff]   ;;  %v3099_v25 = vld [vmem:[#allocation5 + $0x150] ss:$8 sps:$4 sm:$0xff]  }
  0x26   :  { %528 = vmatprep.subr.bf16.mxu1 %v3094_v20  ;;  %v3069_v26 = vld [vmem:[#allocation5 + $0xf0] ss:$8 sps:$4 sm:$0xff]   ;;  %v3100_v27 = vld [vmem:[#allocation5 + $0x144] ss:$8 sps:$4 sm:$0xff]   ;;  %v3102_v29 = vld [vmem:[#allocation5 + $0x140] ss:$8 sps:$4 sm:$0xff]  }
  0x27   :  { %267 = vmatpush1.bf16.msra.mxu0 %v3051_v5  ;;  %v3070_v28 = vld [vmem:[#allocation5 + $0xe4] ss:$8 sps:$4 sm:$0xff]   ;;  %v3072_v30 = vld [vmem:[#allocation5 + $0xe0] ss:$8 sps:$4 sm:$0xff]   ;;  %v3103_v31 = vld [vmem:[#allocation5 + $0x134] ss:$8 sps:$4 sm:$0xff]  }
  0x28   :  { %268 = vmatprep.subr.bf16.mxu0 %v3052_v6  ;;  %v3073_v32 = vld [vmem:[#allocation5 + $0xd4] ss:$8 sps:$4 sm:$0xff]   ;;  %v3075_v33 = vld [vmem:[#allocation5 + $0xd0] ss:$8 sps:$4 sm:$0xff]   ;;  %v3076_v35 = vld [vmem:[#allocation5 + $0xc4] ss:$8 sps:$4 sm:$0xff]  }
  0x29   :  { %529 = vmatpush1.bf16.msra.mxu1 %v3096_v21  ;;  %v3105_v34 = vld [vmem:[#allocation5 + $0x130] ss:$8 sps:$4 sm:$0xff]   ;;  %v3106_v36 = vld [vmem:[#allocation5 + $0x124] ss:$8 sps:$4 sm:$0xff]   ;;  %v3108_v37 = vld [vmem:[#allocation5 + $0x120] ss:$8 sps:$4 sm:$0xff]  }
  0x2a   :  { %530 = vmatprep.subr.bf16.mxu1 %v3097_v23  ;;  %v3078_v38 = vld [vmem:[#allocation5 + $0xc0] ss:$8 sps:$4 sm:$0xff]   ;;  %v3109_v39 = vld [vmem:[#allocation5 + $0x114] ss:$8 sps:$4 sm:$0xff]   ;;  %v3111_v41 = vld [vmem:[#allocation5 + $0x110] ss:$8 sps:$4 sm:$0xff]  }
  0x2b   :  { %269 = vmatpush1.bf16.msra.mxu0 %v3054_v7  ;;  %v3079_v40 = vld [vmem:[#allocation5 + $0xb4] ss:$8 sps:$4 sm:$0xff]   ;;  %v3081_v42 = vld [vmem:[#allocation5 + $0xb0] ss:$8 sps:$4 sm:$0xff]   ;;  %v3112_v43 = vld [vmem:[#allocation5 + $0x104] ss:$8 sps:$4 sm:$0xff]  }
  0x2c   :  { %270 = vmatprep.subr.bf16.mxu0 %v3055_v8  ;;  %v3082_v44 = vld [vmem:[#allocation5 + $0xa4] ss:$8 sps:$4 sm:$0xff]   ;;  %v3114_v45 = vld [vmem:[#allocation5 + $0x100] ss:$8 sps:$4 sm:$0xff]   ;;  %v3115_v47 = vld [vmem:[#allocation5 + $0x1f4] ss:$8 sps:$4 sm:$0xff]  }
  0x2d   :  { %531 = vmatpush1.bf16.msra.mxu1 %v3099_v25  ;;  %v3084_v46 = vld [vmem:[#allocation5 + $0xa0] ss:$8 sps:$4 sm:$0xff]   ;;  %v3085_v48 = vld [vmem:[#allocation5 + $0x94] ss:$8 sps:$4 sm:$0xff]   ;;  %v3117_v49 = vld [vmem:[#allocation5 + $0x1f0] ss:$8 sps:$4 sm:$0xff]  }
  0x2e   :  { %532 = vmatprep.subr.bf16.mxu1 %v3100_v27  ;;  %v3087_v50 = vld [vmem:[#allocation5 + $0x90] ss:$8 sps:$4 sm:$0xff]   ;;  %v3118_v51 = vld [vmem:[#allocation5 + $0x1e4] ss:$8 sps:$4 sm:$0xff]   ;;  %v3120_v53 = vld [vmem:[#allocation5 + $0x1e0] ss:$8 sps:$4 sm:$0xff]  }
  0x2f   :  { %271 = vmatpush1.bf16.msra.mxu0 %v3057_v9  ;;  %v3088_v52 = vld [vmem:[#allocation5 + $0x84] ss:$8 sps:$4 sm:$0xff]   ;;  %v3090_v54 = vld [vmem:[#allocation5 + $0x80] ss:$8 sps:$4 sm:$0xff]   ;;  %v45_v56 = vld [vmem:[#allocation2 + $0x10] sm:$0xff] }
  0x30   :  { %272 = vmatprep.subr.bf16.mxu0 %v3058_v10  ;;  %v3121_v57 = vld [vmem:[#allocation5 + $0x1d4] ss:$8 sps:$4 sm:$0xff]   ;;  %v3123_v58 = vld [vmem:[#allocation5 + $0x1d0] ss:$8 sps:$4 sm:$0xff]   ;;  %v3124_v59 = vld [vmem:[#allocation5 + $0x1c4] ss:$8 sps:$4 sm:$0xff]   ;;  %v47_v60 = vpack.c.bf16 %v45_v56, %v43_v55 }
  0x31   :  { %533 = vmatpush1.bf16.msra.mxu1 %v3102_v29  ;;  %v3126_v61 = vld [vmem:[#allocation5 + $0x1c0] ss:$8 sps:$4 sm:$0xff]   ;;  %v3127_v62 = vld [vmem:[#allocation5 + $0x1b4] ss:$8 sps:$4 sm:$0xff]   ;;  %v3129_v63 = vld [vmem:[#allocation5 + $0x1b0] ss:$8 sps:$4 sm:$0xff]  }
  0x32   :  { %534 = vmatprep.subr.bf16.mxu1 %v3103_v31  ;;  %v3130_v0 = vld [vmem:[#allocation5 + $0x1a4] ss:$8 sps:$4 sm:$0xff]   ;;  %v3132_v1 = vld [vmem:[#allocation5 + $0x1a0] ss:$8 sps:$4 sm:$0xff]   ;;  %v3133_v2 = vld [vmem:[#allocation5 + $0x194] ss:$8 sps:$4 sm:$0xff]  }
  0x33   :  { %273 = vmatpush1.bf16.msra.mxu0 %v3060_v11  ;;  %v3135_v3 = vld [vmem:[#allocation5 + $0x190] ss:$8 sps:$4 sm:$0xff]   ;;  %v3136_v4 = vld [vmem:[#allocation5 + $0x184] ss:$8 sps:$4 sm:$0xff]   ;;  %v3138_v5 = vld [vmem:[#allocation5 + $0x180] ss:$8 sps:$4 sm:$0xff]  }
  0x34   :  { %274 = vmatprep.subr.bf16.mxu0 %v3061_v12  ;;  %v3139_v6 = vld [vmem:[#allocation5 + $0x270] ss:$8 sps:$4 sm:$0xff]   ;;  %v3141_v7 = vld [vmem:[#allocation5 + $0x274] ss:$8 sps:$4 sm:$0xff]   ;;  %v3144_v8 = vld [vmem:[#allocation5 + $0x264] ss:$8 sps:$4 sm:$0xff]  }
  0x35   :  { %535 = vmatpush1.bf16.msra.mxu1 %v3105_v34  ;;  %v3142_v9 = vld [vmem:[#allocation5 + $0x260] ss:$8 sps:$4 sm:$0xff]   ;;  %v3147_v10 = vld [vmem:[#allocation5 + $0x254] ss:$8 sps:$4 sm:$0xff]   ;;  %v3145_v11 = vld [vmem:[#allocation5 + $0x250] ss:$8 sps:$4 sm:$0xff]  }
  0x36   :  { %536 = vmatprep.subr.bf16.mxu1 %v3106_v36  ;;  %v3150_v12 = vld [vmem:[#allocation5 + $0x244] ss:$8 sps:$4 sm:$0xff]   ;;  %v3148_v13 = vld [vmem:[#allocation5 + $0x240] ss:$8 sps:$4 sm:$0xff]   ;;  %v3153_v14 = vld [vmem:[#allocation5 + $0x234] ss:$8 sps:$4 sm:$0xff]  }
  0x37   :  { %275 = vmatpush1.bf16.msra.mxu0 %v3063_v15  ;;  %v3151_v15 = vld [vmem:[#allocation5 + $0x230] ss:$8 sps:$4 sm:$0xff]   ;;  %v3154_v17 = vld [vmem:[#allocation5 + $0x220] ss:$8 sps:$4 sm:$0xff]   ;;  %v3159_v18 = vld [vmem:[#allocation5 + $0x214] ss:$8 sps:$4 sm:$0xff]  }
  0x38   :  { %276 = vmatprep.subr.bf16.mxu0 %v3064_v16  ;;  %v3156_v16 = vld [vmem:[#allocation5 + $0x224] ss:$8 sps:$4 sm:$0xff]   ;;  %v3157_v19 = vld [vmem:[#allocation5 + $0x210] ss:$8 sps:$4 sm:$0xff]   ;;  %v3160_v21 = vld [vmem:[#allocation5 + $0x200] ss:$8 sps:$4 sm:$0xff]  }
  0x39   :  { %537 = vmatpush1.bf16.msra.mxu1 %v3108_v37  ;;  %v3162_v20 = vld [vmem:[#allocation5 + $0x204] ss:$8 sps:$4 sm:$0xff]   ;;  %v3163_v23 = vld [vmem:[#allocation5 + $0x2f0] ss:$8 sps:$4 sm:$0xff]   ;;  %v3166_v25 = vld [vmem:[#allocation5 + $0x2e0] ss:$8 sps:$4 sm:$0xff]  }
  0x3a   :  { %538 = vmatprep.subr.bf16.mxu1 %v3109_v39  ;;  %v3169_v27 = vld [vmem:[#allocation5 + $0x2d0] ss:$8 sps:$4 sm:$0xff]   ;;  %v3172_v29 = vld [vmem:[#allocation5 + $0x2c0] ss:$8 sps:$4 sm:$0xff]   ;;  %v3180_v56 = vld [vmem:[#allocation5 + $0x2a4] ss:$8 sps:$4 sm:$0xff]  }
  0x3b   :  { %277 = vmatpush1.bf16.msra.mxu0 %v3066_v22  ;;  %v3165_v22 = vld [vmem:[#allocation5 + $0x2f4] ss:$8 sps:$4 sm:$0xff]   ;;  %v3175_v31 = vld [vmem:[#allocation5 + $0x2b0] ss:$8 sps:$4 sm:$0xff]   ;;  %v81_v34 = vld [vmem:[%s3707_s2] sm:$0x3] }
  0x3c   :  { %278 = vmatprep.subr.bf16.mxu0 %v3067_v24  ;;  %v3168_v24 = vld [vmem:[#allocation5 + $0x2e4] ss:$8 sps:$4 sm:$0xff]   ;;  %v82_v36 = vunpack.c.l.bf16 %v81_v34 }
  0x3d   :  { %539 = vmatpush1.bf16.msra.mxu1 %v3111_v41 }
  0x3e   :  { %540 = vmatprep.subr.bf16.mxu1 %v3112_v43 }
  0x3f   :  { %279 = vmatpush2.bf16.msra.mxu0 %v3069_v26  ;;  %v3171_v26 = vld [vmem:[#allocation5 + $0x2d4] ss:$8 sps:$4 sm:$0xff]  }
  0x40   :  { %280 = vmatprep.subr.bf16.mxu0 %v3070_v28  ;;  %v3174_v28 = vld [vmem:[#allocation5 + $0x2c4] ss:$8 sps:$4 sm:$0xff]  }
  0x41   :  { %541 = vmatpush1.bf16.msra.mxu1 %v3114_v45 }
  0x42   :  { %542 = vmatprep.subr.bf16.mxu1 %v3115_v47 }
  0x43   :  { %281 = vmatpush2.bf16.msra.mxu0 %v3072_v30  ;;  %v3177_v30 = vld [vmem:[#allocation5 + $0x2b4] ss:$8 sps:$4 sm:$0xff]  }
  0x44   :  { %282 = vmatprep.subr.bf16.mxu0 %v3073_v32  ;;  %v84_v32 = vlaneseq }
  0x45   :  { %543 = vmatpush2.bf16.msra.mxu1 %v3117_v49 }
  0x46   :  { %544 = vmatprep.subr.bf16.mxu1 %v3118_v51 }
  0x47   :  { %283 = vmatpush2.bf16.msra.mxu0 %v3075_v33  ;;  %v85_v33 = vshrl.u32 %v84_v32, 7 }
  0x48   :  { %284 = vmatprep.subr.bf16.mxu0 %v3076_v35 }
  0x49   :  { %545 = vmatpush2.bf16.msra.mxu1 %v3120_v53  ;;  %v3628_v35 = vsub.s32 2, %v85_v33  ;;  %v3630_v37 = vsub.s32 0, %v85_v33 }
  0x4a   :  { %546 = vmatprep.subr.bf16.mxu1 %v3121_v57  ;;  %v3178_v57 = vld [vmem:[#allocation5 + $0x2a0] ss:$8 sps:$4 sm:$0xff]  }
  0x4b   :  { %285 = vmatpush2.bf16.msra.mxu0 %v3078_v38  ;;  %v91_v38 = vrot.slane %v82_v36, %v3628_v35  ;;  %v87_v39 = vrot.slane %v82_v36, %v3630_v37 }
  0x4c   :  { %286 = vmatprep.subr.bf16.mxu0 %v3079_v40 }
  0x4d   :  { %547 = vmatpush2.bf16.msra.mxu1 %v3123_v58  ;;  %v101_v41 = vrot.slane %v91_v38, %v3630_v37  ;;  %v3183_v58 = vld [vmem:[#allocation5 + $0x294] ss:$8 sps:$4 sm:$0xff]  }
  0x4e   :  { %548 = vmatprep.subr.bf16.mxu1 %v3124_v59  ;;  %v3181_v59 = vld [vmem:[#allocation5 + $0x290] ss:$8 sps:$4 sm:$0xff]  }
  0x4f   :  { %287 = vmatpush2.bf16.msra.mxu0 %v3081_v42  ;;  %v97_v42 = vrot.slane %v87_v39, %v3630_v37 }
  0x50   :  { %288 = vmatprep.subr.bf16.mxu0 %v3082_v44 }
  0x51   :  { %549 = vmatpush2.bf16.msra.mxu1 %v3126_v61  ;;  %v3184_v61 = vld [vmem:[#allocation5 + $0x280] ss:$8 sps:$4 sm:$0xff]  }
  0x52   :  { %550 = vmatprep.subr.bf16.mxu1 %v3127_v62  ;;  %v3187_v62 = vld [vmem:[#allocation5 + $0x370] ss:$8 sps:$4 sm:$0xff]  }
  0x53   :  { %289 = vmatpush2.bf16.msra.mxu0 %v3084_v46 }
  0x54   :  { %290 = vmatprep.subr.bf16.mxu0 %v3085_v48 }
  0x55   :  { %551 = vmatpush2.bf16.msra.mxu1 %v3129_v63  ;;  %v3189_v63 = vld [vmem:[#allocation5 + $0x374] ss:$8 sps:$4 sm:$0xff]  }
  0x56   :  { %552 = vmatprep.subr.bf16.mxu1 %v3130_v0  ;;  %v3192_v0 = vld [vmem:[#allocation5 + $0x364] ss:$8 sps:$4 sm:$0xff]  }
  0x57   :  { %291 = vmatpush2.bf16.msra.mxu0 %v3087_v50 }
  0x58   :  { %292 = vmatprep.subr.bf16.mxu0 %v3088_v52 }
  0x59   :  { %553 = vmatpush2.bf16.msra.mxu1 %v3132_v1  ;;  %v3190_v1 = vld [vmem:[#allocation5 + $0x360] ss:$8 sps:$4 sm:$0xff]  }
  0x5a   :  { %554 = vmatprep.subr.bf16.mxu1 %v3133_v2  ;;  %v3195_v2 = vld [vmem:[#allocation5 + $0x354] ss:$8 sps:$4 sm:$0xff]  }
  0x5b   :  { %293 = vmatpush2.bf16.msra.mxu0 %v3090_v54 }
  0x5c   :  { %790 = vmatprep.subr.bf16.mxu0 %v3141_v7  ;;  %v3199_v7 = vld [vmem:[#allocation5 + $0x330] ss:$8 sps:$4 sm:$0xff]  }
  0x5d   :  { %555 = vmatpush2.bf16.msra.mxu1 %v3135_v3  ;;  %v3193_v3 = vld [vmem:[#allocation5 + $0x350] ss:$8 sps:$4 sm:$0xff]  }
  0x5e   :  { %295 = vmatmul.mubr.bf16.vlgmr.msra.gmra.mxu0 %v47_v60  ;;  %556 = vmatprep.subr.bf16.mxu1 %v3136_v4  ;;  %v3186_v60 = vld [vmem:[#allocation5 + $0x284] ss:$8 sps:$4 sm:$0xff]  }
  0x5f   :  { %791 = vmatpush1.bf16.msra.mxu0 %v3139_v6  ;;  %v3198_v4 = vld [vmem:[#allocation5 + $0x344] ss:$8 sps:$4 sm:$0xff]   ;;  %v3201_v6 = vld [vmem:[#allocation5 + $0x334] ss:$8 sps:$4 sm:$0xff]  }
  0x60   :  { %792 = vmatprep.subr.bf16.mxu0 %v3144_v8  ;;  %v3204_v8 = vld [vmem:[#allocation5 + $0x324] ss:$8 sps:$4 sm:$0xff]  }
  0x61   :  { %557 = vmatpush2.bf16.msra.mxu1 %v3138_v5  ;;  %v3196_v5 = vld [vmem:[#allocation5 + $0x340] ss:$8 sps:$4 sm:$0xff]  }
  0x62   :  { %1054 = vmatprep.subr.bf16.mxu1 %v3189_v63  ;;  %v3250_v63 = vld [vmem:[#allocation5 + $0x420] ss:$8 sps:$4 sm:$0xff]  }
  0x63   :  { %793 = vmatpush1.bf16.msra.mxu0 %v3142_v9  ;;  %v3202_v9 = vld [vmem:[#allocation5 + $0x320] ss:$8 sps:$4 sm:$0xff]  }
  0x64   :  { %794 = vmatprep.subr.bf16.mxu0 %v3147_v10  ;;  %v3207_v10 = vld [vmem:[#allocation5 + $0x314] ss:$8 sps:$4 sm:$0xff]  }
  0x67   :  { %795 = vmatpush1.bf16.msra.mxu0 %v3145_v11  ;;  %v3205_v11 = vld [vmem:[#allocation5 + $0x310] ss:$8 sps:$4 sm:$0xff]  }
  0x68   :  { %796 = vmatprep.subr.bf16.mxu0 %v3150_v12  ;;  %v3210_v12 = vld [vmem:[#allocation5 + $0x304] ss:$8 sps:$4 sm:$0xff]  }
  0x6b   :  { %797 = vmatpush1.bf16.msra.mxu0 %v3148_v13  ;;  %v3208_v13 = vld [vmem:[#allocation5 + $0x300] ss:$8 sps:$4 sm:$0xff]  }
  0x6c   :  { %798 = vmatprep.subr.bf16.mxu0 %v3153_v14  ;;  %v3213_v14 = vld [vmem:[#allocation5 + $0x3f4] ss:$8 sps:$4 sm:$0xff]  }
  0x6f   :  { %799 = vmatpush1.bf16.msra.mxu0 %v3151_v15  ;;  %v3211_v15 = vld [vmem:[#allocation5 + $0x3f0] ss:$8 sps:$4 sm:$0xff]  }
  0x70   :  { %800 = vmatprep.subr.bf16.mxu0 %v3156_v16  ;;  %v3216_v16 = vld [vmem:[#allocation5 + $0x3e4] ss:$8 sps:$4 sm:$0xff]  }
  0x73   :  { %801 = vmatpush1.bf16.msra.mxu0 %v3154_v17  ;;  %v3214_v17 = vld [vmem:[#allocation5 + $0x3e0] ss:$8 sps:$4 sm:$0xff]  }
  0x74   :  { %802 = vmatprep.subr.bf16.mxu0 %v3159_v18  ;;  %v3219_v18 = vld [vmem:[#allocation5 + $0x3d4] ss:$8 sps:$4 sm:$0xff]  }
  0x77   :  { %803 = vmatpush1.bf16.msra.mxu0 %v3157_v19  ;;  %v3217_v19 = vld [vmem:[#allocation5 + $0x3d0] ss:$8 sps:$4 sm:$0xff]  }
  0x78   :  { %804 = vmatprep.subr.bf16.mxu0 %v3162_v20  ;;  %v3222_v20 = vld [vmem:[#allocation5 + $0x3c4] ss:$8 sps:$4 sm:$0xff]  }
  0x7b   :  { %805 = vmatpush1.bf16.msra.mxu0 %v3160_v21  ;;  %v3220_v21 = vld [vmem:[#allocation5 + $0x3c0] ss:$8 sps:$4 sm:$0xff]  }
  0x7c   :  { %806 = vmatprep.subr.bf16.mxu0 %v3165_v22  ;;  %v3225_v22 = vld [vmem:[#allocation5 + $0x3b4] ss:$8 sps:$4 sm:$0xff]  }
  0x7f   :  { %807 = vmatpush2.bf16.msra.mxu0 %v3163_v23  ;;  %v3223_v23 = vld [vmem:[#allocation5 + $0x3b0] ss:$8 sps:$4 sm:$0xff]  }
  0x80   :  { %808 = vmatprep.subr.bf16.mxu0 %v3168_v24  ;;  %v2739_v24 = vld [vmem:[%s3707_s2 + $0x2] sm:$0x3] }
  0x83   :  { %809 = vmatpush2.bf16.msra.mxu0 %v3166_v25  ;;  %v346_v25 = vunpack.c.l.bf16 %v2739_v24 }
  0x84   :  { %810 = vmatprep.subr.bf16.mxu0 %v3171_v26 }
  0x85   :  { %v355_v26 = vrot.slane %v346_v25, %v3628_v35 }
  0x87   :  { %811 = vmatpush2.bf16.msra.mxu0 %v3169_v27  ;;  %v351_v27 = vrot.slane %v346_v25, %v3630_v37 }
  0x88   :  { %812 = vmatprep.subr.bf16.mxu0 %v3174_v28 }
  0x8b   :  { %813 = vmatpush2.bf16.msra.mxu0 %v3172_v29  ;;  %v365_v29 = vrot.slane %v355_v26, %v3630_v37 }
  0x8c   :  { %814 = vmatprep.subr.bf16.mxu0 %v3177_v30  ;;  %v361_v30 = vrot.slane %v351_v27, %v3630_v37 }
  0x8f   :  { %815 = vmatpush2.bf16.msra.mxu0 %v3175_v31 }
  0x90   :  { %816 = vmatprep.subr.bf16.mxu0 %v3180_v56  ;;  %v3243_v56 = vld [vmem:[#allocation5 + $0x454] ss:$8 sps:$4 sm:$0xff]  }
  0x93   :  { %817 = vmatpush2.bf16.msra.mxu0 %v3178_v57  ;;  %v3241_v57 = vld [vmem:[#allocation5 + $0x450] ss:$8 sps:$4 sm:$0xff]  }
  0x94   :  { %818 = vmatprep.subr.bf16.mxu0 %v3183_v58  ;;  %v3246_v58 = vld [vmem:[#allocation5 + $0x444] ss:$8 sps:$4 sm:$0xff]  }
  0x97   :  { %819 = vmatpush2.bf16.msra.mxu0 %v3181_v59  ;;  %v3244_v59 = vld [vmem:[#allocation5 + $0x440] ss:$8 sps:$4 sm:$0xff]  }
  0x98   :  { %820 = vmatprep.subr.bf16.mxu0 %v3186_v60  ;;  %v3249_v60 = vld [vmem:[#allocation5 + $0x434] ss:$8 sps:$4 sm:$0xff]  }
  0x9b   :  { %821 = vmatpush2.bf16.msra.mxu0 %v3184_v61  ;;  %v3247_v61 = vld [vmem:[#allocation5 + $0x430] ss:$8 sps:$4 sm:$0xff]  }
 0x11e   :  { %v296_v40 = vpop.f32.mrf.mxu0 }
 0x11f   :  { %v297_v47 = vadd.f32 %v296_v40, %v97_v42 }
 0x120   :  { %v298_v43 = vpop.f32.mrf.mxu0 }
 0x121   :  { %v299_v45 = vadd.f32 %v298_v43, %v101_v41  ;;  %v305_v53 = vmax.f32 %v297_v47, 0.0  ;;  %v3226_v47 = vld [vmem:[#allocation5 + $0x3a0] ss:$8 sps:$4 sm:$0xff]  }
 0x122   :  { %v300_v44 = vpop.f32.mrf.mxu0 }
 0x123   :  { %v301_v46 = vadd.f32 %v300_v44, %v97_v42  ;;  %v306_v51 = vmax.f32 %v299_v45, 0.0 }
 0x124   :  { %v302_v48 = vpop.f32.mrf.mxu0 }
 0x125   :  { %v303_v49 = vadd.f32 %v302_v48, %v101_v41  ;;  %v307_v50 = vmax.f32 %v301_v46, 0.0  ;;  %v3228_v46 = vld [vmem:[#allocation5 + $0x3a4] ss:$8 sps:$4 sm:$0xff]   ;;  %v3231_v48 = vld [vmem:[#allocation5 + $0x394] ss:$8 sps:$4 sm:$0xff]  }
 0x127   :  { %v308_v52 = vmax.f32 %v303_v49, 0.0  ;;  %v309_v55 = vpack.c.bf16 %v307_v50, %v305_v53  ;;  %v3229_v49 = vld [vmem:[#allocation5 + $0x390] ss:$8 sps:$4 sm:$0xff]   ;;  %v3234_v50 = vld [vmem:[#allocation5 + $0x384] ss:$8 sps:$4 sm:$0xff]  }
 0x128   :  { %v3237_v53 = vld [vmem:[#allocation5 + $0x474] ss:$8 sps:$4 sm:$0xff]  }
 0x129   :  { %v310_v54 = vpack.c.bf16 %v308_v52, %v306_v51  ;;  %v3232_v51 = vld [vmem:[#allocation5 + $0x380] ss:$8 sps:$4 sm:$0xff]   ;;  %v3235_v52 = vld [vmem:[#allocation5 + $0x470] ss:$8 sps:$4 sm:$0xff]   ;;  %1318 = vmatprep.subr.bf16.mxu0 %v3237_v53 }
 0x12a   :  { %v3298_v53 = vld [vmem:[#allocation5 + $0x520] ss:$8 sps:$4 sm:$0xff]  }
 0x12b   :  { %558 = vmatprep.mubr.bf16.mxu1 %v310_v54  ;;  %v3240_v54 = vld [vmem:[#allocation5 + $0x464] ss:$8 sps:$4 sm:$0xff]  }
 0x12c   :  { %559 = vmatmul.mubr.bf16.vlgmr.msra.gmra.mxu1 %v309_v55  ;;  %v3238_v55 = vld [vmem:[#allocation5 + $0x460] ss:$8 sps:$4 sm:$0xff]  }
 0x12d   :  { %1055 = vmatpush1.bf16.msra.mxu1 %v3187_v62  ;;  %v3252_v62 = vld [vmem:[#allocation5 + $0x424] ss:$8 sps:$4 sm:$0xff]  }
 0x12e   :  { %1056 = vmatprep.subr.bf16.mxu1 %v3192_v0  ;;  %v3255_v0 = vld [vmem:[#allocation5 + $0x414] ss:$8 sps:$4 sm:$0xff]  }
 0x131   :  { %1057 = vmatpush1.bf16.msra.mxu1 %v3190_v1  ;;  %v3253_v1 = vld [vmem:[#allocation5 + $0x410] ss:$8 sps:$4 sm:$0xff]  }
 0x132   :  { %1058 = vmatprep.subr.bf16.mxu1 %v3195_v2  ;;  %v3258_v2 = vld [vmem:[#allocation5 + $0x404] ss:$8 sps:$4 sm:$0xff]  }
 0x135   :  { %1059 = vmatpush1.bf16.msra.mxu1 %v3193_v3  ;;  %v3256_v3 = vld [vmem:[#allocation5 + $0x400] ss:$8 sps:$4 sm:$0xff]  }
 0x136   :  { %1060 = vmatprep.subr.bf16.mxu1 %v3198_v4  ;;  %v3261_v4 = vld [vmem:[#allocation5 + $0x4f4] ss:$8 sps:$4 sm:$0xff]  }
 0x139   :  { %1061 = vmatpush1.bf16.msra.mxu1 %v3196_v5  ;;  %v3259_v5 = vld [vmem:[#allocation5 + $0x4f0] ss:$8 sps:$4 sm:$0xff]  }
 0x13a   :  { %1062 = vmatprep.subr.bf16.mxu1 %v3201_v6  ;;  %v3264_v6 = vld [vmem:[#allocation5 + $0x4e4] ss:$8 sps:$4 sm:$0xff]  }
 0x13d   :  { %1063 = vmatpush1.bf16.msra.mxu1 %v3199_v7  ;;  %v3262_v7 = vld [vmem:[#allocation5 + $0x4e0] ss:$8 sps:$4 sm:$0xff]  }
 0x13e   :  { %1064 = vmatprep.subr.bf16.mxu1 %v3204_v8  ;;  %v3267_v8 = vld [vmem:[#allocation5 + $0x4d4] ss:$8 sps:$4 sm:$0xff]  }
 0x141   :  { %1065 = vmatpush1.bf16.msra.mxu1 %v3202_v9  ;;  %v3265_v9 = vld [vmem:[#allocation5 + $0x4d0] ss:$8 sps:$4 sm:$0xff]  }
 0x142   :  { %1066 = vmatprep.subr.bf16.mxu1 %v3207_v10  ;;  %v3270_v10 = vld [vmem:[#allocation5 + $0x4c4] ss:$8 sps:$4 sm:$0xff]  }
 0x145   :  { %1067 = vmatpush1.bf16.msra.mxu1 %v3205_v11  ;;  %v3268_v11 = vld [vmem:[#allocation5 + $0x4c0] ss:$8 sps:$4 sm:$0xff]  }
 0x146   :  { %1068 = vmatprep.subr.bf16.mxu1 %v3210_v12  ;;  %v3273_v12 = vld [vmem:[#allocation5 + $0x4b4] ss:$8 sps:$4 sm:$0xff]  }
 0x149   :  { %1069 = vmatpush1.bf16.msra.mxu1 %v3208_v13  ;;  %v3271_v13 = vld [vmem:[#allocation5 + $0x4b0] ss:$8 sps:$4 sm:$0xff]  }
 0x14a   :  { %1070 = vmatprep.subr.bf16.mxu1 %v3213_v14  ;;  %v2772_v14 = vld [vmem:[%s3707_s2 + $0x4] sm:$0x3] }
 0x14d   :  { %1071 = vmatpush2.bf16.msra.mxu1 %v3211_v15  ;;  %v610_v15 = vunpack.c.l.bf16 %v2772_v14 }
 0x14e   :  { %1072 = vmatprep.subr.bf16.mxu1 %v3216_v16 }
 0x14f   :  { %v619_v16 = vrot.slane %v610_v15, %v3628_v35 }
 0x151   :  { %1073 = vmatpush2.bf16.msra.mxu1 %v3214_v17  ;;  %v615_v17 = vrot.slane %v610_v15, %v3630_v37 }
 0x152   :  { %1074 = vmatprep.subr.bf16.mxu1 %v3219_v18 }
 0x155   :  { %1075 = vmatpush2.bf16.msra.mxu1 %v3217_v19  ;;  %v629_v19 = vrot.slane %v619_v16, %v3630_v37 }
 0x156   :  { %1076 = vmatprep.subr.bf16.mxu1 %v3222_v20  ;;  %v625_v20 = vrot.slane %v615_v17, %v3630_v37 }
 0x159   :  { %1077 = vmatpush2.bf16.msra.mxu1 %v3220_v21 }
 0x15a   :  { %1078 = vmatprep.subr.bf16.mxu1 %v3225_v22 }
 0x15d   :  { %1079 = vmatpush2.bf16.msra.mxu1 %v3223_v23 }
 0x15e   :  { %1080 = vmatprep.subr.bf16.mxu1 %v3228_v46  ;;  %v3291_v46 = vld [vmem:[#allocation5 + $0x554] ss:$8 sps:$4 sm:$0xff]  }
 0x161   :  { %1081 = vmatpush2.bf16.msra.mxu1 %v3226_v47  ;;  %v3289_v47 = vld [vmem:[#allocation5 + $0x550] ss:$8 sps:$4 sm:$0xff]  }
 0x162   :  { %1082 = vmatprep.subr.bf16.mxu1 %v3231_v48  ;;  %v3294_v48 = vld [vmem:[#allocation5 + $0x544] ss:$8 sps:$4 sm:$0xff]  }
 0x165   :  { %1083 = vmatpush2.bf16.msra.mxu1 %v3229_v49  ;;  %v3292_v49 = vld [vmem:[#allocation5 + $0x540] ss:$8 sps:$4 sm:$0xff]  }
 0x166   :  { %1084 = vmatprep.subr.bf16.mxu1 %v3234_v50  ;;  %v3297_v50 = vld [vmem:[#allocation5 + $0x534] ss:$8 sps:$4 sm:$0xff]  }
 0x169   :  { %1085 = vmatpush2.bf16.msra.mxu1 %v3232_v51  ;;  %v3295_v51 = vld [vmem:[#allocation5 + $0x530] ss:$8 sps:$4 sm:$0xff]  }
 0x1ec   :  { %v560_v28 = vpop.f32.mrf.mxu1 }
 0x1ed   :  { %v561_v36 = vadd.f32 %v560_v28, %v361_v30 }
 0x1ee   :  { %v562_v31 = vpop.f32.mrf.mxu1 }
 0x1ef   :  { %v563_v33 = vadd.f32 %v562_v31, %v365_v29  ;;  %v569_v43 = vmax.f32 %v561_v36, 0.0  ;;  %v3274_v36 = vld [vmem:[#allocation5 + $0x4a0] ss:$8 sps:$4 sm:$0xff]  }
 0x1f0   :  { %v564_v32 = vpop.f32.mrf.mxu1 }
 0x1f1   :  { %v565_v34 = vadd.f32 %v564_v32, %v361_v30  ;;  %v570_v41 = vmax.f32 %v563_v33, 0.0 }
 0x1f2   :  { %v566_v38 = vpop.f32.mrf.mxu1 }
 0x1f3   :  { %v567_v39 = vadd.f32 %v566_v38, %v365_v29  ;;  %v571_v40 = vmax.f32 %v565_v34, 0.0  ;;  %v3276_v34 = vld [vmem:[#allocation5 + $0x4a4] ss:$8 sps:$4 sm:$0xff]   ;;  %v3279_v38 = vld [vmem:[#allocation5 + $0x494] ss:$8 sps:$4 sm:$0xff]  }
 0x1f5   :  { %v572_v42 = vmax.f32 %v567_v39, 0.0  ;;  %v573_v45 = vpack.c.bf16 %v571_v40, %v569_v43  ;;  %v3277_v39 = vld [vmem:[#allocation5 + $0x490] ss:$8 sps:$4 sm:$0xff]   ;;  %v3282_v40 = vld [vmem:[#allocation5 + $0x484] ss:$8 sps:$4 sm:$0xff]  }
 0x1f6   :  { %v3285_v43 = vld [vmem:[#allocation5 + $0x574] ss:$8 sps:$4 sm:$0xff]  }
 0x1f7   :  { %v574_v44 = vpack.c.bf16 %v572_v42, %v570_v41  ;;  %v3280_v41 = vld [vmem:[#allocation5 + $0x480] ss:$8 sps:$4 sm:$0xff]   ;;  %v3283_v42 = vld [vmem:[#allocation5 + $0x570] ss:$8 sps:$4 sm:$0xff]   ;;  %1582 = vmatprep.subr.bf16.mxu1 %v3285_v43 }
 0x1f8   :  { %v3346_v43 = vld [vmem:[#allocation5 + $0x620] ss:$8 sps:$4 sm:$0xff]  }
 0x1f9   :  { %822 = vmatprep.mubr.bf16.mxu0 %v574_v44  ;;  %v3288_v44 = vld [vmem:[#allocation5 + $0x564] ss:$8 sps:$4 sm:$0xff]  }
 0x1fa   :  { %823 = vmatmul.mubr.bf16.vlgmr.msra.gmra.mxu0 %v573_v45  ;;  %v3286_v45 = vld [vmem:[#allocation5 + $0x560] ss:$8 sps:$4 sm:$0xff]  }
 0x1fb   :  { %1319 = vmatpush1.bf16.msra.mxu0 %v3235_v52  ;;  %v3300_v52 = vld [vmem:[#allocation5 + $0x524] ss:$8 sps:$4 sm:$0xff]  }
 0x1fc   :  { %1320 = vmatprep.subr.bf16.mxu0 %v3240_v54  ;;  %v3303_v54 = vld [vmem:[#allocation5 + $0x514] ss:$8 sps:$4 sm:$0xff]  }
 0x1ff   :  { %1321 = vmatpush1.bf16.msra.mxu0 %v3238_v55  ;;  %v3301_v55 = vld [vmem:[#allocation5 + $0x510] ss:$8 sps:$4 sm:$0xff]  }
 0x200   :  { %1322 = vmatprep.subr.bf16.mxu0 %v3243_v56  ;;  %v3306_v56 = vld [vmem:[#allocation5 + $0x504] ss:$8 sps:$4 sm:$0xff]  }
 0x203   :  { %1323 = vmatpush1.bf16.msra.mxu0 %v3241_v57  ;;  %v3304_v57 = vld [vmem:[#allocation5 + $0x500] ss:$8 sps:$4 sm:$0xff]  }
 0x204   :  { %1324 = vmatprep.subr.bf16.mxu0 %v3246_v58  ;;  %v3309_v58 = vld [vmem:[#allocation5 + $0x5f4] ss:$8 sps:$4 sm:$0xff]  }
 0x207   :  { %1325 = vmatpush1.bf16.msra.mxu0 %v3244_v59  ;;  %v3307_v59 = vld [vmem:[#allocation5 + $0x5f0] ss:$8 sps:$4 sm:$0xff]  }
 0x208   :  { %1326 = vmatprep.subr.bf16.mxu0 %v3249_v60  ;;  %v3312_v60 = vld [vmem:[#allocation5 + $0x5e4] ss:$8 sps:$4 sm:$0xff]  }
 0x20b   :  { %1327 = vmatpush1.bf16.msra.mxu0 %v3247_v61  ;;  %v3310_v61 = vld [vmem:[#allocation5 + $0x5e0] ss:$8 sps:$4 sm:$0xff]  }
 0x20c   :  { %1328 = vmatprep.subr.bf16.mxu0 %v3252_v62  ;;  %v3315_v62 = vld [vmem:[#allocation5 + $0x5d4] ss:$8 sps:$4 sm:$0xff]  }
 0x20f   :  { %1329 = vmatpush1.bf16.msra.mxu0 %v3250_v63  ;;  %v3313_v63 = vld [vmem:[#allocation5 + $0x5d0] ss:$8 sps:$4 sm:$0xff]  }
 0x210   :  { %1330 = vmatprep.subr.bf16.mxu0 %v3255_v0  ;;  %v3318_v0 = vld [vmem:[#allocation5 + $0x5c4] ss:$8 sps:$4 sm:$0xff]  }
 0x213   :  { %1331 = vmatpush1.bf16.msra.mxu0 %v3253_v1  ;;  %v3316_v1 = vld [vmem:[#allocation5 + $0x5c0] ss:$8 sps:$4 sm:$0xff]  }
 0x214   :  { %1332 = vmatprep.subr.bf16.mxu0 %v3258_v2  ;;  %v3321_v2 = vld [vmem:[#allocation5 + $0x5b4] ss:$8 sps:$4 sm:$0xff]  }
 0x217   :  { %1333 = vmatpush1.bf16.msra.mxu0 %v3256_v3  ;;  %v3319_v3 = vld [vmem:[#allocation5 + $0x5b0] ss:$8 sps:$4 sm:$0xff]  }
 0x218   :  { %1334 = vmatprep.subr.bf16.mxu0 %v3261_v4  ;;  %v2805_v4 = vld [vmem:[%s3707_s2 + $0x6] sm:$0x3] }
 0x21b   :  { %1335 = vmatpush2.bf16.msra.mxu0 %v3259_v5  ;;  %v874_v5 = vunpack.c.l.bf16 %v2805_v4 }
 0x21c   :  { %1336 = vmatprep.subr.bf16.mxu0 %v3264_v6 }
 0x21d   :  { %v883_v6 = vrot.slane %v874_v5, %v3628_v35 }
 0x21f   :  { %1337 = vmatpush2.bf16.msra.mxu0 %v3262_v7  ;;  %v879_v7 = vrot.slane %v874_v5, %v3630_v37 }
 0x220   :  { %1338 = vmatprep.subr.bf16.mxu0 %v3267_v8 }
 0x223   :  { %1339 = vmatpush2.bf16.msra.mxu0 %v3265_v9  ;;  %v893_v9 = vrot.slane %v883_v6, %v3630_v37 }
 0x224   :  { %1340 = vmatprep.subr.bf16.mxu0 %v3270_v10  ;;  %v889_v10 = vrot.slane %v879_v7, %v3630_v37 }
 0x227   :  { %1341 = vmatpush2.bf16.msra.mxu0 %v3268_v11 }
 0x228   :  { %1342 = vmatprep.subr.bf16.mxu0 %v3273_v12 }
 0x22b   :  { %1343 = vmatpush2.bf16.msra.mxu0 %v3271_v13 }
 0x22c   :  { %1344 = vmatprep.subr.bf16.mxu0 %v3276_v34  ;;  %v3339_v34 = vld [vmem:[#allocation5 + $0x654] ss:$8 sps:$4 sm:$0xff]  }
 0x22f   :  { %1345 = vmatpush2.bf16.msra.mxu0 %v3274_v36  ;;  %v3337_v36 = vld [vmem:[#allocation5 + $0x650] ss:$8 sps:$4 sm:$0xff]  }
 0x230   :  { %1346 = vmatprep.subr.bf16.mxu0 %v3279_v38  ;;  %v3342_v38 = vld [vmem:[#allocation5 + $0x644] ss:$8 sps:$4 sm:$0xff]  }
 0x233   :  { %1347 = vmatpush2.bf16.msra.mxu0 %v3277_v39  ;;  %v3340_v39 = vld [vmem:[#allocation5 + $0x640] ss:$8 sps:$4 sm:$0xff]  }
 0x234   :  { %1348 = vmatprep.subr.bf16.mxu0 %v3282_v40  ;;  %v3345_v40 = vld [vmem:[#allocation5 + $0x634] ss:$8 sps:$4 sm:$0xff]  }
 0x237   :  { %1349 = vmatpush2.bf16.msra.mxu0 %v3280_v41  ;;  %v3343_v41 = vld [vmem:[#allocation5 + $0x630] ss:$8 sps:$4 sm:$0xff]  }
 0x2ba   :  { %v824_v18 = vpop.f32.mrf.mxu0 }
 0x2bb   :  { %v825_v25 = vadd.f32 %v824_v18, %v625_v20 }
 0x2bc   :  { %v826_v21 = vpop.f32.mrf.mxu0 }
 0x2bd   :  { %v827_v23 = vadd.f32 %v826_v21, %v629_v19  ;;  %v833_v31 = vmax.f32 %v825_v25, 0.0  ;;  %v3322_v25 = vld [vmem:[#allocation5 + $0x5a0] ss:$8 sps:$4 sm:$0xff]  }
 0x2be   :  { %v828_v22 = vpop.f32.mrf.mxu0 }
 0x2bf   :  { %v829_v24 = vadd.f32 %v828_v22, %v625_v20  ;;  %v834_v29 = vmax.f32 %v827_v23, 0.0 }
 0x2c0   :  { %v830_v26 = vpop.f32.mrf.mxu0 }
 0x2c1   :  { %v831_v27 = vadd.f32 %v830_v26, %v629_v19  ;;  %v835_v28 = vmax.f32 %v829_v24, 0.0  ;;  %v3324_v24 = vld [vmem:[#allocation5 + $0x5a4] ss:$8 sps:$4 sm:$0xff]   ;;  %v3327_v26 = vld [vmem:[#allocation5 + $0x594] ss:$8 sps:$4 sm:$0xff]  }
 0x2c3   :  { %v836_v30 = vmax.f32 %v831_v27, 0.0  ;;  %v837_v33 = vpack.c.bf16 %v835_v28, %v833_v31  ;;  %v3325_v27 = vld [vmem:[#allocation5 + $0x590] ss:$8 sps:$4 sm:$0xff]   ;;  %v3330_v28 = vld [vmem:[#allocation5 + $0x584] ss:$8 sps:$4 sm:$0xff]  }
 0x2c4   :  { %v3333_v31 = vld [vmem:[#allocation5 + $0x674] ss:$8 sps:$4 sm:$0xff]  }
 0x2c5   :  { %v838_v32 = vpack.c.bf16 %v836_v30, %v834_v29  ;;  %v3328_v29 = vld [vmem:[#allocation5 + $0x580] ss:$8 sps:$4 sm:$0xff]   ;;  %v3331_v30 = vld [vmem:[#allocation5 + $0x670] ss:$8 sps:$4 sm:$0xff]   ;;  %1846 = vmatprep.subr.bf16.mxu0 %v3333_v31 }
 0x2c6   :  { %v3394_v31 = vld [vmem:[#allocation5 + $0x720] ss:$8 sps:$4 sm:$0xff]  }
 0x2c7   :  { %1086 = vmatprep.mubr.bf16.mxu1 %v838_v32  ;;  %v3336_v32 = vld [vmem:[#allocation5 + $0x664] ss:$8 sps:$4 sm:$0xff]  }
 0x2c8   :  { %1087 = vmatmul.mubr.bf16.vlgmr.msra.gmra.mxu1 %v837_v33  ;;  %v3334_v33 = vld [vmem:[#allocation5 + $0x660] ss:$8 sps:$4 sm:$0xff]  }
 0x2c9   :  { %1583 = vmatpush1.bf16.msra.mxu1 %v3283_v42  ;;  %v3348_v42 = vld [vmem:[#allocation5 + $0x624] ss:$8 sps:$4 sm:$0xff]  }
 0x2ca   :  { %1584 = vmatprep.subr.bf16.mxu1 %v3288_v44  ;;  %v3351_v44 = vld [vmem:[#allocation5 + $0x614] ss:$8 sps:$4 sm:$0xff]  }
 0x2cd   :  { %1585 = vmatpush1.bf16.msra.mxu1 %v3286_v45  ;;  %v3349_v45 = vld [vmem:[#allocation5 + $0x610] ss:$8 sps:$4 sm:$0xff]  }
 0x2ce   :  { %1586 = vmatprep.subr.bf16.mxu1 %v3291_v46  ;;  %v3354_v46 = vld [vmem:[#allocation5 + $0x604] ss:$8 sps:$4 sm:$0xff]  }
 0x2d1   :  { %1587 = vmatpush1.bf16.msra.mxu1 %v3289_v47  ;;  %v3352_v47 = vld [vmem:[#allocation5 + $0x600] ss:$8 sps:$4 sm:$0xff]  }
 0x2d2   :  { %1588 = vmatprep.subr.bf16.mxu1 %v3294_v48  ;;  %v3357_v48 = vld [vmem:[#allocation5 + $0x6f4] ss:$8 sps:$4 sm:$0xff]  }
 0x2d5   :  { %1589 = vmatpush1.bf16.msra.mxu1 %v3292_v49  ;;  %v3355_v49 = vld [vmem:[#allocation5 + $0x6f0] ss:$8 sps:$4 sm:$0xff]  }
 0x2d6   :  { %1590 = vmatprep.subr.bf16.mxu1 %v3297_v50  ;;  %v3360_v50 = vld [vmem:[#allocation5 + $0x6e4] ss:$8 sps:$4 sm:$0xff]  }
 0x2d9   :  { %1591 = vmatpush1.bf16.msra.mxu1 %v3295_v51  ;;  %v3358_v51 = vld [vmem:[#allocation5 + $0x6e0] ss:$8 sps:$4 sm:$0xff]  }
 0x2da   :  { %1592 = vmatprep.subr.bf16.mxu1 %v3300_v52  ;;  %v3363_v52 = vld [vmem:[#allocation5 + $0x6d4] ss:$8 sps:$4 sm:$0xff]  }
 0x2dd   :  { %1593 = vmatpush1.bf16.msra.mxu1 %v3298_v53  ;;  %v3361_v53 = vld [vmem:[#allocation5 + $0x6d0] ss:$8 sps:$4 sm:$0xff]  }
 0x2de   :  { %1594 = vmatprep.subr.bf16.mxu1 %v3303_v54  ;;  %v3366_v54 = vld [vmem:[#allocation5 + $0x6c4] ss:$8 sps:$4 sm:$0xff]  }
 0x2e1   :  { %1595 = vmatpush1.bf16.msra.mxu1 %v3301_v55  ;;  %v3364_v55 = vld [vmem:[#allocation5 + $0x6c0] ss:$8 sps:$4 sm:$0xff]  }
 0x2e2   :  { %1596 = vmatprep.subr.bf16.mxu1 %v3306_v56  ;;  %v3369_v56 = vld [vmem:[#allocation5 + $0x6b4] ss:$8 sps:$4 sm:$0xff]  }
 0x2e5   :  { %1597 = vmatpush1.bf16.msra.mxu1 %v3304_v57  ;;  %v3367_v57 = vld [vmem:[#allocation5 + $0x6b0] ss:$8 sps:$4 sm:$0xff]  }
 0x2e6   :  { %1598 = vmatprep.subr.bf16.mxu1 %v3309_v58  ;;  %v2838_v58 = vld [vmem:[%s3707_s2 + $0x8] sm:$0x3] }
 0x2e9   :  { %1599 = vmatpush2.bf16.msra.mxu1 %v3307_v59  ;;  %v1138_v59 = vunpack.c.l.bf16 %v2838_v58 }
 0x2ea   :  { %1600 = vmatprep.subr.bf16.mxu1 %v3312_v60 }
 0x2eb   :  { %v1147_v60 = vrot.slane %v1138_v59, %v3628_v35 }
 0x2ed   :  { %1601 = vmatpush2.bf16.msra.mxu1 %v3310_v61  ;;  %v1143_v61 = vrot.slane %v1138_v59, %v3630_v37 }
 0x2ee   :  { %1602 = vmatprep.subr.bf16.mxu1 %v3315_v62 }
 0x2f1   :  { %1603 = vmatpush2.bf16.msra.mxu1 %v3313_v63  ;;  %v1157_v63 = vrot.slane %v1147_v60, %v3630_v37 }
 0x2f2   :  { %1604 = vmatprep.subr.bf16.mxu1 %v3318_v0  ;;  %v1153_v0 = vrot.slane %v1143_v61, %v3630_v37 }
 0x2f5   :  { %1605 = vmatpush2.bf16.msra.mxu1 %v3316_v1 }
 0x2f6   :  { %1606 = vmatprep.subr.bf16.mxu1 %v3321_v2 }
 0x2f9   :  { %1607 = vmatpush2.bf16.msra.mxu1 %v3319_v3 }
 0x2fa   :  { %1608 = vmatprep.subr.bf16.mxu1 %v3324_v24  ;;  %v3387_v24 = vld [vmem:[#allocation5 + $0x754] ss:$8 sps:$4 sm:$0xff]  }
 0x2fd   :  { %1609 = vmatpush2.bf16.msra.mxu1 %v3322_v25  ;;  %v3385_v25 = vld [vmem:[#allocation5 + $0x750] ss:$8 sps:$4 sm:$0xff]  }
 0x2fe   :  { %1610 = vmatprep.subr.bf16.mxu1 %v3327_v26  ;;  %v3390_v26 = vld [vmem:[#allocation5 + $0x744] ss:$8 sps:$4 sm:$0xff]  }
 0x301   :  { %1611 = vmatpush2.bf16.msra.mxu1 %v3325_v27  ;;  %v3388_v27 = vld [vmem:[#allocation5 + $0x740] ss:$8 sps:$4 sm:$0xff]  }
 0x302   :  { %1612 = vmatprep.subr.bf16.mxu1 %v3330_v28  ;;  %v3393_v28 = vld [vmem:[#allocation5 + $0x734] ss:$8 sps:$4 sm:$0xff]  }
 0x305   :  { %1613 = vmatpush2.bf16.msra.mxu1 %v3328_v29  ;;  %v3391_v29 = vld [vmem:[#allocation5 + $0x730] ss:$8 sps:$4 sm:$0xff]  }
 0x388   :  { %v1088_v8 = vpop.f32.mrf.mxu1 }
 0x389   :  { %v1089_v15 = vadd.f32 %v1088_v8, %v889_v10 }
 0x38a   :  { %v1090_v11 = vpop.f32.mrf.mxu1 }
 0x38b   :  { %v1091_v13 = vadd.f32 %v1090_v11, %v893_v9  ;;  %v1097_v21 = vmax.f32 %v1089_v15, 0.0  ;;  %v3370_v15 = vld [vmem:[#allocation5 + $0x6a0] ss:$8 sps:$4 sm:$0xff]  }
 0x38c   :  { %v1092_v12 = vpop.f32.mrf.mxu1 }
 0x38d   :  { %v1093_v14 = vadd.f32 %v1092_v12, %v889_v10  ;;  %v1098_v19 = vmax.f32 %v1091_v13, 0.0 }
 0x38e   :  { %v1094_v16 = vpop.f32.mrf.mxu1 }
 0x38f   :  { %v1095_v17 = vadd.f32 %v1094_v16, %v893_v9  ;;  %v1099_v18 = vmax.f32 %v1093_v14, 0.0  ;;  %v3372_v14 = vld [vmem:[#allocation5 + $0x6a4] ss:$8 sps:$4 sm:$0xff]   ;;  %v3375_v16 = vld [vmem:[#allocation5 + $0x694] ss:$8 sps:$4 sm:$0xff]  }
 0x391   :  { %v1100_v20 = vmax.f32 %v1095_v17, 0.0  ;;  %v1101_v23 = vpack.c.bf16 %v1099_v18, %v1097_v21  ;;  %v3373_v17 = vld [vmem:[#allocation5 + $0x690] ss:$8 sps:$4 sm:$0xff]   ;;  %v3378_v18 = vld [vmem:[#allocation5 + $0x684] ss:$8 sps:$4 sm:$0xff]  }
 0x392   :  { %v3381_v21 = vld [vmem:[#allocation5 + $0x774] ss:$8 sps:$4 sm:$0xff]  }
 0x393   :  { %v1102_v22 = vpack.c.bf16 %v1100_v20, %v1098_v19  ;;  %v3376_v19 = vld [vmem:[#allocation5 + $0x680] ss:$8 sps:$4 sm:$0xff]   ;;  %v3379_v20 = vld [vmem:[#allocation5 + $0x770] ss:$8 sps:$4 sm:$0xff]   ;;  %2110 = vmatprep.subr.bf16.mxu1 %v3381_v21 }
 0x394   :  { %v3442_v21 = vld [vmem:[#allocation5 + $0x820] ss:$8 sps:$4 sm:$0xff]  }
 0x395   :  { %1350 = vmatprep.mubr.bf16.mxu0 %v1102_v22  ;;  %v3384_v22 = vld [vmem:[#allocation5 + $0x764] ss:$8 sps:$4 sm:$0xff]  }
 0x396   :  { %1351 = vmatmul.mubr.bf16.vlgmr.msra.gmra.mxu0 %v1101_v23  ;;  %v3382_v23 = vld [vmem:[#allocation5 + $0x760] ss:$8 sps:$4 sm:$0xff]  }
 0x397   :  { %1847 = vmatpush1.bf16.msra.mxu0 %v3331_v30  ;;  %v3396_v30 = vld [vmem:[#allocation5 + $0x724] ss:$8 sps:$4 sm:$0xff]  }
 0x398   :  { %1848 = vmatprep.subr.bf16.mxu0 %v3336_v32  ;;  %v3399_v32 = vld [vmem:[#allocation5 + $0x714] ss:$8 sps:$4 sm:$0xff]  }
 0x39b   :  { %1849 = vmatpush1.bf16.msra.mxu0 %v3334_v33  ;;  %v3397_v33 = vld [vmem:[#allocation5 + $0x710] ss:$8 sps:$4 sm:$0xff]  }
 0x39c   :  { %1850 = vmatprep.subr.bf16.mxu0 %v3339_v34  ;;  %v3402_v34 = vld [vmem:[#allocation5 + $0x704] ss:$8 sps:$4 sm:$0xff]  }
 0x39f   :  { %1851 = vmatpush1.bf16.msra.mxu0 %v3337_v36  ;;  %v3400_v36 = vld [vmem:[#allocation5 + $0x700] ss:$8 sps:$4 sm:$0xff]  }
 0x3a0   :  { %1852 = vmatprep.subr.bf16.mxu0 %v3342_v38  ;;  %v3405_v38 = vld [vmem:[#allocation5 + $0x7f4] ss:$8 sps:$4 sm:$0xff]  }
 0x3a3   :  { %1853 = vmatpush1.bf16.msra.mxu0 %v3340_v39  ;;  %v3403_v39 = vld [vmem:[#allocation5 + $0x7f0] ss:$8 sps:$4 sm:$0xff]  }
 0x3a4   :  { %1854 = vmatprep.subr.bf16.mxu0 %v3345_v40  ;;  %v3408_v40 = vld [vmem:[#allocation5 + $0x7e4] ss:$8 sps:$4 sm:$0xff]  }
 0x3a7   :  { %1855 = vmatpush1.bf16.msra.mxu0 %v3343_v41  ;;  %v3406_v41 = vld [vmem:[#allocation5 + $0x7e0] ss:$8 sps:$4 sm:$0xff]  }
 0x3a8   :  { %1856 = vmatprep.subr.bf16.mxu0 %v3348_v42  ;;  %v3411_v42 = vld [vmem:[#allocation5 + $0x7d4] ss:$8 sps:$4 sm:$0xff]  }
 0x3ab   :  { %1857 = vmatpush1.bf16.msra.mxu0 %v3346_v43  ;;  %v3409_v43 = vld [vmem:[#allocation5 + $0x7d0] ss:$8 sps:$4 sm:$0xff]  }
 0x3ac   :  { %1858 = vmatprep.subr.bf16.mxu0 %v3351_v44  ;;  %v3414_v44 = vld [vmem:[#allocation5 + $0x7c4] ss:$8 sps:$4 sm:$0xff]  }
 0x3af   :  { %1859 = vmatpush1.bf16.msra.mxu0 %v3349_v45  ;;  %v3412_v45 = vld [vmem:[#allocation5 + $0x7c0] ss:$8 sps:$4 sm:$0xff]  }
 0x3b0   :  { %1860 = vmatprep.subr.bf16.mxu0 %v3354_v46  ;;  %v3417_v46 = vld [vmem:[#allocation5 + $0x7b4] ss:$8 sps:$4 sm:$0xff]  }
 0x3b3   :  { %1861 = vmatpush1.bf16.msra.mxu0 %v3352_v47  ;;  %v3415_v47 = vld [vmem:[#allocation5 + $0x7b0] ss:$8 sps:$4 sm:$0xff]  }
 0x3b4   :  { %1862 = vmatprep.subr.bf16.mxu0 %v3357_v48  ;;  %v2871_v48 = vld [vmem:[%s3707_s2 + $0xa] sm:$0x3] }
 0x3b7   :  { %1863 = vmatpush2.bf16.msra.mxu0 %v3355_v49  ;;  %v1402_v49 = vunpack.c.l.bf16 %v2871_v48 }
 0x3b8   :  { %1864 = vmatprep.subr.bf16.mxu0 %v3360_v50 }
 0x3b9   :  { %v1411_v50 = vrot.slane %v1402_v49, %v3628_v35 }
 0x3bb   :  { %1865 = vmatpush2.bf16.msra.mxu0 %v3358_v51  ;;  %v1407_v51 = vrot.slane %v1402_v49, %v3630_v37 }
 0x3bc   :  { %1866 = vmatprep.subr.bf16.mxu0 %v3363_v52 }
 0x3bf   :  { %1867 = vmatpush2.bf16.msra.mxu0 %v3361_v53  ;;  %v1421_v53 = vrot.slane %v1411_v50, %v3630_v37 }
 0x3c0   :  { %1868 = vmatprep.subr.bf16.mxu0 %v3366_v54  ;;  %v1417_v54 = vrot.slane %v1407_v51, %v3630_v37 }
 0x3c3   :  { %1869 = vmatpush2.bf16.msra.mxu0 %v3364_v55 }
 0x3c4   :  { %1870 = vmatprep.subr.bf16.mxu0 %v3369_v56 }
 0x3c7   :  { %1871 = vmatpush2.bf16.msra.mxu0 %v3367_v57 }
 0x3c8   :  { %1872 = vmatprep.subr.bf16.mxu0 %v3372_v14  ;;  %v3435_v14 = vld [vmem:[#allocation5 + $0x854] ss:$8 sps:$4 sm:$0xff]  }
 0x3cb   :  { %1873 = vmatpush2.bf16.msra.mxu0 %v3370_v15  ;;  %v3433_v15 = vld [vmem:[#allocation5 + $0x850] ss:$8 sps:$4 sm:$0xff]  }
 0x3cc   :  { %1874 = vmatprep.subr.bf16.mxu0 %v3375_v16  ;;  %v3438_v16 = vld [vmem:[#allocation5 + $0x844] ss:$8 sps:$4 sm:$0xff]  }
 0x3cf   :  { %1875 = vmatpush2.bf16.msra.mxu0 %v3373_v17  ;;  %v3436_v17 = vld [vmem:[#allocation5 + $0x840] ss:$8 sps:$4 sm:$0xff]  }
 0x3d0   :  { %1876 = vmatprep.subr.bf16.mxu0 %v3378_v18  ;;  %v3441_v18 = vld [vmem:[#allocation5 + $0x834] ss:$8 sps:$4 sm:$0xff]  }
 0x3d3   :  { %1877 = vmatpush2.bf16.msra.mxu0 %v3376_v19  ;;  %v3439_v19 = vld [vmem:[#allocation5 + $0x830] ss:$8 sps:$4 sm:$0xff]  }
 0x456   :  { %v1352_v62 = vpop.f32.mrf.mxu0 }
 0x457   :  { %v1353_v5 = vadd.f32 %v1352_v62, %v1153_v0 }
 0x458   :  { %v1354_v1 = vpop.f32.mrf.mxu0 }
 0x459   :  { %v1355_v3 = vadd.f32 %v1354_v1, %v1157_v63  ;;  %v1361_v11 = vmax.f32 %v1353_v5, 0.0  ;;  %v3418_v5 = vld [vmem:[#allocation5 + $0x7a0] ss:$8 sps:$4 sm:$0xff]  }
 0x45a   :  { %v1356_v2 = vpop.f32.mrf.mxu0 }
 0x45b   :  { %v1357_v4 = vadd.f32 %v1356_v2, %v1153_v0  ;;  %v1362_v9 = vmax.f32 %v1355_v3, 0.0 }
 0x45c   :  { %v1358_v6 = vpop.f32.mrf.mxu0 }
 0x45d   :  { %v1359_v7 = vadd.f32 %v1358_v6, %v1157_v63  ;;  %v1363_v8 = vmax.f32 %v1357_v4, 0.0  ;;  %v3420_v4 = vld [vmem:[#allocation5 + $0x7a4] ss:$8 sps:$4 sm:$0xff]   ;;  %v3423_v6 = vld [vmem:[#allocation5 + $0x794] ss:$8 sps:$4 sm:$0xff]  }
 0x45f   :  { %v1364_v10 = vmax.f32 %v1359_v7, 0.0  ;;  %v1365_v13 = vpack.c.bf16 %v1363_v8, %v1361_v11  ;;  %v3421_v7 = vld [vmem:[#allocation5 + $0x790] ss:$8 sps:$4 sm:$0xff]   ;;  %v3426_v8 = vld [vmem:[#allocation5 + $0x784] ss:$8 sps:$4 sm:$0xff]  }
 0x460   :  { %v3429_v11 = vld [vmem:[#allocation5 + $0x874] ss:$8 sps:$4 sm:$0xff]  }
 0x461   :  { %v1366_v12 = vpack.c.bf16 %v1364_v10, %v1362_v9  ;;  %v3424_v9 = vld [vmem:[#allocation5 + $0x780] ss:$8 sps:$4 sm:$0xff]   ;;  %v3427_v10 = vld [vmem:[#allocation5 + $0x870] ss:$8 sps:$4 sm:$0xff]   ;;  %2374 = vmatprep.subr.bf16.mxu0 %v3429_v11 }
 0x462   :  { %v3490_v11 = vld [vmem:[#allocation5 + $0x920] ss:$8 sps:$4 sm:$0xff]  }
 0x463   :  { %1614 = vmatprep.mubr.bf16.mxu1 %v1366_v12  ;;  %v3432_v12 = vld [vmem:[#allocation5 + $0x864] ss:$8 sps:$4 sm:$0xff]  }
 0x464   :  { %1615 = vmatmul.mubr.bf16.vlgmr.msra.gmra.mxu1 %v1365_v13  ;;  %v3430_v13 = vld [vmem:[#allocation5 + $0x860] ss:$8 sps:$4 sm:$0xff]  }
 0x465   :  { %2111 = vmatpush1.bf16.msra.mxu1 %v3379_v20  ;;  %v3444_v20 = vld [vmem:[#allocation5 + $0x824] ss:$8 sps:$4 sm:$0xff]  }
 0x466   :  { %2112 = vmatprep.subr.bf16.mxu1 %v3384_v22  ;;  %v3447_v22 = vld [vmem:[#allocation5 + $0x814] ss:$8 sps:$4 sm:$0xff]  }
 0x469   :  { %2113 = vmatpush1.bf16.msra.mxu1 %v3382_v23  ;;  %v3445_v23 = vld [vmem:[#allocation5 + $0x810] ss:$8 sps:$4 sm:$0xff]  }
 0x46a   :  { %2114 = vmatprep.subr.bf16.mxu1 %v3387_v24  ;;  %v3450_v24 = vld [vmem:[#allocation5 + $0x804] ss:$8 sps:$4 sm:$0xff]  }
 0x46d   :  { %2115 = vmatpush1.bf16.msra.mxu1 %v3385_v25  ;;  %v3448_v25 = vld [vmem:[#allocation5 + $0x800] ss:$8 sps:$4 sm:$0xff]  }
 0x46e   :  { %2116 = vmatprep.subr.bf16.mxu1 %v3390_v26  ;;  %v3453_v26 = vld [vmem:[#allocation5 + $0x8f4] ss:$8 sps:$4 sm:$0xff]  }
 0x471   :  { %2117 = vmatpush1.bf16.msra.mxu1 %v3388_v27  ;;  %v3451_v27 = vld [vmem:[#allocation5 + $0x8f0] ss:$8 sps:$4 sm:$0xff]  }
 0x472   :  { %2118 = vmatprep.subr.bf16.mxu1 %v3393_v28  ;;  %v3456_v28 = vld [vmem:[#allocation5 + $0x8e4] ss:$8 sps:$4 sm:$0xff]  }
 0x475   :  { %2119 = vmatpush1.bf16.msra.mxu1 %v3391_v29  ;;  %v3454_v29 = vld [vmem:[#allocation5 + $0x8e0] ss:$8 sps:$4 sm:$0xff]  }
 0x476   :  { %2120 = vmatprep.subr.bf16.mxu1 %v3396_v30  ;;  %v3459_v30 = vld [vmem:[#allocation5 + $0x8d4] ss:$8 sps:$4 sm:$0xff]  }
 0x479   :  { %2121 = vmatpush1.bf16.msra.mxu1 %v3394_v31  ;;  %v3457_v31 = vld [vmem:[#allocation5 + $0x8d0] ss:$8 sps:$4 sm:$0xff]  }
 0x47a   :  { %2122 = vmatprep.subr.bf16.mxu1 %v3399_v32  ;;  %v3462_v32 = vld [vmem:[#allocation5 + $0x8c4] ss:$8 sps:$4 sm:$0xff]  }
 0x47d   :  { %2123 = vmatpush1.bf16.msra.mxu1 %v3397_v33  ;;  %v3460_v33 = vld [vmem:[#allocation5 + $0x8c0] ss:$8 sps:$4 sm:$0xff]  }
 0x47e   :  { %2124 = vmatprep.subr.bf16.mxu1 %v3402_v34  ;;  %v3465_v34 = vld [vmem:[#allocation5 + $0x8b4] ss:$8 sps:$4 sm:$0xff]  }
 0x481   :  { %2125 = vmatpush1.bf16.msra.mxu1 %v3400_v36  ;;  %v3463_v36 = vld [vmem:[#allocation5 + $0x8b0] ss:$8 sps:$4 sm:$0xff]  }
 0x482   :  { %2126 = vmatprep.subr.bf16.mxu1 %v3405_v38  ;;  %v2904_v38 = vld [vmem:[%s3707_s2 + $0xc] sm:$0x3] }
 0x485   :  { %2127 = vmatpush2.bf16.msra.mxu1 %v3403_v39  ;;  %v1666_v39 = vunpack.c.l.bf16 %v2904_v38 }
 0x486   :  { %2128 = vmatprep.subr.bf16.mxu1 %v3408_v40 }
 0x487   :  { %v1675_v40 = vrot.slane %v1666_v39, %v3628_v35 }
 0x489   :  { %2129 = vmatpush2.bf16.msra.mxu1 %v3406_v41  ;;  %v1671_v41 = vrot.slane %v1666_v39, %v3630_v37 }
 0x48a   :  { %2130 = vmatprep.subr.bf16.mxu1 %v3411_v42 }
 0x48d   :  { %2131 = vmatpush2.bf16.msra.mxu1 %v3409_v43  ;;  %v1685_v43 = vrot.slane %v1675_v40, %v3630_v37 }
 0x48e   :  { %2132 = vmatprep.subr.bf16.mxu1 %v3414_v44  ;;  %v1681_v44 = vrot.slane %v1671_v41, %v3630_v37 }
 0x491   :  { %2133 = vmatpush2.bf16.msra.mxu1 %v3412_v45 }
 0x492   :  { %2134 = vmatprep.subr.bf16.mxu1 %v3417_v46 }
 0x495   :  { %2135 = vmatpush2.bf16.msra.mxu1 %v3415_v47 }
 0x496   :  { %2136 = vmatprep.subr.bf16.mxu1 %v3420_v4  ;;  %v3483_v4 = vld [vmem:[#allocation5 + $0x954] ss:$8 sps:$4 sm:$0xff]  }
 0x499   :  { %2137 = vmatpush2.bf16.msra.mxu1 %v3418_v5  ;;  %v3481_v5 = vld [vmem:[#allocation5 + $0x950] ss:$8 sps:$4 sm:$0xff]  }
 0x49a   :  { %2138 = vmatprep.subr.bf16.mxu1 %v3423_v6  ;;  %v3486_v6 = vld [vmem:[#allocation5 + $0x944] ss:$8 sps:$4 sm:$0xff]  }
 0x49d   :  { %2139 = vmatpush2.bf16.msra.mxu1 %v3421_v7  ;;  %v3484_v7 = vld [vmem:[#allocation5 + $0x940] ss:$8 sps:$4 sm:$0xff]  }
 0x49e   :  { %2140 = vmatprep.subr.bf16.mxu1 %v3426_v8  ;;  %v3489_v8 = vld [vmem:[#allocation5 + $0x934] ss:$8 sps:$4 sm:$0xff]  }
 0x4a1   :  { %2141 = vmatpush2.bf16.msra.mxu1 %v3424_v9  ;;  %v3487_v9 = vld [vmem:[#allocation5 + $0x930] ss:$8 sps:$4 sm:$0xff]  }
 0x524   :  { %v1616_v52 = vpop.f32.mrf.mxu1 }
 0x525   :  { %v1617_v59 = vadd.f32 %v1616_v52, %v1417_v54 }
 0x526   :  { %v1618_v55 = vpop.f32.mrf.mxu1 }
 0x527   :  { %v1619_v57 = vadd.f32 %v1618_v55, %v1421_v53  ;;  %v1625_v1 = vmax.f32 %v1617_v59, 0.0  ;;  %v3466_v59 = vld [vmem:[#allocation5 + $0x8a0] ss:$8 sps:$4 sm:$0xff]  }
 0x528   :  { %v1620_v56 = vpop.f32.mrf.mxu1 }
 0x529   :  { %v1621_v58 = vadd.f32 %v1620_v56, %v1417_v54  ;;  %v1626_v63 = vmax.f32 %v1619_v57, 0.0 }
 0x52a   :  { %v1622_v60 = vpop.f32.mrf.mxu1 }
 0x52b   :  { %v1623_v61 = vadd.f32 %v1622_v60, %v1421_v53  ;;  %v1627_v62 = vmax.f32 %v1621_v58, 0.0  ;;  %v3468_v58 = vld [vmem:[#allocation5 + $0x8a4] ss:$8 sps:$4 sm:$0xff]   ;;  %v3471_v60 = vld [vmem:[#allocation5 + $0x894] ss:$8 sps:$4 sm:$0xff]  }
 0x52d   :  { %v1628_v0 = vmax.f32 %v1623_v61, 0.0  ;;  %v1629_v3 = vpack.c.bf16 %v1627_v62, %v1625_v1  ;;  %v3469_v61 = vld [vmem:[#allocation5 + $0x890] ss:$8 sps:$4 sm:$0xff]   ;;  %v3474_v62 = vld [vmem:[#allocation5 + $0x884] ss:$8 sps:$4 sm:$0xff]  }
 0x52e   :  { %v3477_v1 = vld [vmem:[#allocation5 + $0x974] ss:$8 sps:$4 sm:$0xff]  }
 0x52f   :  { %v1630_v2 = vpack.c.bf16 %v1628_v0, %v1626_v63  ;;  %v3472_v63 = vld [vmem:[#allocation5 + $0x880] ss:$8 sps:$4 sm:$0xff]   ;;  %v3475_v0 = vld [vmem:[#allocation5 + $0x970] ss:$8 sps:$4 sm:$0xff]   ;;  %2638 = vmatprep.subr.bf16.mxu1 %v3477_v1 }
 0x531   :  { %1878 = vmatprep.mubr.bf16.mxu0 %v1630_v2  ;;  %v3480_v2 = vld [vmem:[#allocation5 + $0x964] ss:$8 sps:$4 sm:$0xff]  }
 0x532   :  { %1879 = vmatmul.mubr.bf16.vlgmr.msra.gmra.mxu0 %v1629_v3  ;;  %v3478_v3 = vld [vmem:[#allocation5 + $0x960] ss:$8 sps:$4 sm:$0xff]  }
 0x533   :  { %2375 = vmatpush1.bf16.msra.mxu0 %v3427_v10  ;;  %v3492_v10 = vld [vmem:[#allocation5 + $0x924] ss:$8 sps:$4 sm:$0xff]  }
 0x534   :  { %2376 = vmatprep.subr.bf16.mxu0 %v3432_v12  ;;  %v3495_v12 = vld [vmem:[#allocation5 + $0x914] ss:$8 sps:$4 sm:$0xff]  }
 0x537   :  { %2377 = vmatpush1.bf16.msra.mxu0 %v3430_v13  ;;  %v3493_v13 = vld [vmem:[#allocation5 + $0x910] ss:$8 sps:$4 sm:$0xff]  }
 0x538   :  { %2378 = vmatprep.subr.bf16.mxu0 %v3435_v14  ;;  %v3498_v14 = vld [vmem:[#allocation5 + $0x904] ss:$8 sps:$4 sm:$0xff]  }
 0x53b   :  { %2379 = vmatpush1.bf16.msra.mxu0 %v3433_v15  ;;  %v3496_v15 = vld [vmem:[#allocation5 + $0x900] ss:$8 sps:$4 sm:$0xff]  }
 0x53c   :  { %2380 = vmatprep.subr.bf16.mxu0 %v3438_v16  ;;  %v3501_v16 = vld [vmem:[#allocation5 + $0x9f4] ss:$8 sps:$4 sm:$0xff]  }
 0x53f   :  { %2381 = vmatpush1.bf16.msra.mxu0 %v3436_v17  ;;  %v3499_v17 = vld [vmem:[#allocation5 + $0x9f0] ss:$8 sps:$4 sm:$0xff]  }
 0x540   :  { %2382 = vmatprep.subr.bf16.mxu0 %v3441_v18  ;;  %v3504_v18 = vld [vmem:[#allocation5 + $0x9e4] ss:$8 sps:$4 sm:$0xff]  }
 0x543   :  { %2383 = vmatpush1.bf16.msra.mxu0 %v3439_v19  ;;  %v3502_v19 = vld [vmem:[#allocation5 + $0x9e0] ss:$8 sps:$4 sm:$0xff]  }
 0x544   :  { %2384 = vmatprep.subr.bf16.mxu0 %v3444_v20  ;;  %v3507_v20 = vld [vmem:[#allocation5 + $0x9d4] ss:$8 sps:$4 sm:$0xff]  }
 0x547   :  { %2385 = vmatpush1.bf16.msra.mxu0 %v3442_v21  ;;  %v3505_v21 = vld [vmem:[#allocation5 + $0x9d0] ss:$8 sps:$4 sm:$0xff]  }
 0x548   :  { %2386 = vmatprep.subr.bf16.mxu0 %v3447_v22  ;;  %v3510_v22 = vld [vmem:[#allocation5 + $0x9c4] ss:$8 sps:$4 sm:$0xff]  }
 0x54b   :  { %2387 = vmatpush1.bf16.msra.mxu0 %v3445_v23  ;;  %v3508_v23 = vld [vmem:[#allocation5 + $0x9c0] ss:$8 sps:$4 sm:$0xff]  }
 0x54c   :  { %2388 = vmatprep.subr.bf16.mxu0 %v3450_v24  ;;  %v3513_v24 = vld [vmem:[#allocation5 + $0x9b4] ss:$8 sps:$4 sm:$0xff]  }
 0x54f   :  { %2389 = vmatpush1.bf16.msra.mxu0 %v3448_v25  ;;  %v3511_v25 = vld [vmem:[#allocation5 + $0x9b0] ss:$8 sps:$4 sm:$0xff]  }
 0x550   :  { %2390 = vmatprep.subr.bf16.mxu0 %v3453_v26  ;;  %v2937_v26 = vld [vmem:[%s3707_s2 + $0xe] sm:$0x3] }
 0x553   :  { %2391 = vmatpush2.bf16.msra.mxu0 %v3451_v27  ;;  %v1930_v27 = vunpack.c.l.bf16 %v2937_v26 }
 0x554   :  { %2392 = vmatprep.subr.bf16.mxu0 %v3456_v28 }
 0x555   :  { %v1939_v28 = vrot.slane %v1930_v27, %v3628_v35 }
 0x557   :  { %2393 = vmatpush2.bf16.msra.mxu0 %v3454_v29  ;;  %v1935_v29 = vrot.slane %v1930_v27, %v3630_v37 }
 0x558   :  { %2394 = vmatprep.subr.bf16.mxu0 %v3459_v30 }
 0x55b   :  { %2395 = vmatpush2.bf16.msra.mxu0 %v3457_v31  ;;  %v1949_v31 = vrot.slane %v1939_v28, %v3630_v37 }
 0x55c   :  { %2396 = vmatprep.subr.bf16.mxu0 %v3462_v32  ;;  %v1945_v32 = vrot.slane %v1935_v29, %v3630_v37 }
 0x55f   :  { %2397 = vmatpush2.bf16.msra.mxu0 %v3460_v33 }
 0x560   :  { %2398 = vmatprep.subr.bf16.mxu0 %v3465_v34 }
 0x563   :  { %2399 = vmatpush2.bf16.msra.mxu0 %v3463_v36 }
 0x564   :  { %2400 = vmatprep.subr.bf16.mxu0 %v3468_v58 }
 0x567   :  { %2401 = vmatpush2.bf16.msra.mxu0 %v3466_v59 }
 0x568   :  { %2402 = vmatprep.subr.bf16.mxu0 %v3471_v60 }
 0x56b   :  { %2403 = vmatpush2.bf16.msra.mxu0 %v3469_v61 }
 0x56c   :  { %2404 = vmatprep.subr.bf16.mxu0 %v3474_v62 }
 0x56f   :  { %2405 = vmatpush2.bf16.msra.mxu0 %v3472_v63 }
 0x5f2   :  { %v1880_v42 = vpop.f32.mrf.mxu0 }
 0x5f3   :  { %v1881_v49 = vadd.f32 %v1880_v42, %v1681_v44 }
 0x5f4   :  { %v1882_v45 = vpop.f32.mrf.mxu0 }
 0x5f5   :  { %v1883_v47 = vadd.f32 %v1882_v45, %v1685_v43  ;;  %v1889_v55 = vmax.f32 %v1881_v49, 0.0  ;;  %v3514_v49 = vld [vmem:[#allocation5 + $0x9a0] ss:$8 sps:$4 sm:$0xff]  }
 0x5f6   :  { %v1884_v46 = vpop.f32.mrf.mxu0 }
 0x5f7   :  { %v1885_v48 = vadd.f32 %v1884_v46, %v1681_v44  ;;  %v1890_v53 = vmax.f32 %v1883_v47, 0.0 }
 0x5f8   :  { %v1886_v50 = vpop.f32.mrf.mxu0 }
 0x5f9   :  { %v1887_v51 = vadd.f32 %v1886_v50, %v1685_v43  ;;  %v1891_v52 = vmax.f32 %v1885_v48, 0.0  ;;  %v3516_v48 = vld [vmem:[#allocation5 + $0x9a4] ss:$8 sps:$4 sm:$0xff]   ;;  %v3519_v50 = vld [vmem:[#allocation5 + $0x994] ss:$8 sps:$4 sm:$0xff]  }
 0x5fb   :  { %v1892_v54 = vmax.f32 %v1887_v51, 0.0  ;;  %v1893_v57 = vpack.c.bf16 %v1891_v52, %v1889_v55  ;;  %v3517_v51 = vld [vmem:[#allocation5 + $0x990] ss:$8 sps:$4 sm:$0xff]   ;;  %v3522_v52 = vld [vmem:[#allocation5 + $0x984] ss:$8 sps:$4 sm:$0xff]  }
 0x5fd   :  { %v1894_v56 = vpack.c.bf16 %v1892_v54, %v1890_v53  ;;  %v3520_v53 = vld [vmem:[#allocation5 + $0x980] ss:$8 sps:$4 sm:$0xff]   ;;  %v2970_v54 = vld [vmem:[%s3707_s2 + $0x10] sm:$0x3] }
 0x5fe   :  { %v2194_v55 = vunpack.c.l.bf16 %v2970_v54 }
 0x5ff   :  { %2142 = vmatprep.mubr.bf16.mxu1 %v1894_v56 }
 0x600   :  { %2143 = vmatmul.mubr.bf16.vlgmr.msra.gmra.mxu1 %v1893_v57  ;;  %v2203_v56 = vrot.slane %v2194_v55, %v3628_v35  ;;  %v2199_v57 = vrot.slane %v2194_v55, %v3630_v37 }
 0x601   :  { %2639 = vmatpush1.bf16.msra.mxu1 %v3475_v0 }
 0x602   :  { %2640 = vmatprep.subr.bf16.mxu1 %v3480_v2  ;;  %v2213_v59 = vrot.slane %v2203_v56, %v3630_v37  ;;  %v2209_v60 = vrot.slane %v2199_v57, %v3630_v37 }
 0x605   :  { %2641 = vmatpush1.bf16.msra.mxu1 %v3478_v3 }
 0x606   :  { %2642 = vmatprep.subr.bf16.mxu1 %v3483_v4 }
 0x609   :  { %2643 = vmatpush1.bf16.msra.mxu1 %v3481_v5 }
 0x60a   :  { %2644 = vmatprep.subr.bf16.mxu1 %v3486_v6 }
 0x60d   :  { %2645 = vmatpush1.bf16.msra.mxu1 %v3484_v7 }
 0x60e   :  { %2646 = vmatprep.subr.bf16.mxu1 %v3489_v8 }
 0x611   :  { %2647 = vmatpush1.bf16.msra.mxu1 %v3487_v9 }
 0x612   :  { %2648 = vmatprep.subr.bf16.mxu1 %v3492_v10  ;;  %v3003_v10 = vld [vmem:[%s3707_s2 + $0x12] sm:$0x3]  ;;  %s3595_s2 = smov [#allocation7]  }
 0x613   :  { %s2694_s19 = sshll.u32 %s3595_s2, 4  ;;  %s2695_s19 = int_to_ptr.vmem [resolvable:$true] %s2694_s19 }
 0x614   :  { %s3563_s20 = scalar_lea.vmem %s2695_s19, 512  ;;  %p3568_p11 = scmp.lt.s32.totalorder %s2695_s19, %s2695_s19 }
 0x615   :  { %2649 = vmatpush1.bf16.msra.mxu1 %v3490_v11  ;;  %v2458_v11 = vunpack.c.l.bf16 %v3003_v10  ;;  %p3564_p10 = scmp.ne.s32.totalorder %s2695_s19, %s3563_s20  ;;  %p3569_p12 = scmp.lt.s32.totalorder %s3563_s20, %s3563_s20 }
 0x616   :  { %2650 = vmatprep.subr.bf16.mxu1 %v3495_v12 }
 0x617   :  { %v2463_v12 = vrot.slane %v2458_v11, %v3630_v37  ;;  %p3570_p13 = por %p3569_p12, %p3568_p11 }
 0x619   :  { %2651 = vmatpush1.bf16.msra.mxu1 %v3493_v13  ;;  %v2467_v13 = vrot.slane %v2458_v11, %v3628_v35  ;;  %p3571_p0 = pnand %p3570_p13, %p3564_p10 }
 0x61a   :  { %2652 = vmatprep.subr.bf16.mxu1 %v3498_v14  ;;  %v2473_v14 = vrot.slane %v2463_v12, %v3630_v37 }
 0x61d   :  { %2653 = vmatpush1.bf16.msra.mxu1 %v3496_v15  ;;  %v2477_v15 = vrot.slane %v2467_v13, %v3630_v37 }
 0x61e   :  { %2654 = vmatprep.subr.bf16.mxu1 %v3501_v16 }
 0x621   :  { %2655 = vmatpush2.bf16.msra.mxu1 %v3499_v17 }
 0x622   :  { %2656 = vmatprep.subr.bf16.mxu1 %v3504_v18 }
 0x625   :  { %2657 = vmatpush2.bf16.msra.mxu1 %v3502_v19 }
 0x626   :  { %2658 = vmatprep.subr.bf16.mxu1 %v3507_v20 }
 0x629   :  { %2659 = vmatpush2.bf16.msra.mxu1 %v3505_v21 }
 0x62a   :  { %2660 = vmatprep.subr.bf16.mxu1 %v3510_v22 }
 0x62d   :  { %2661 = vmatpush2.bf16.msra.mxu1 %v3508_v23 }
 0x62e   :  { %2662 = vmatprep.subr.bf16.mxu1 %v3513_v24 }
 0x631   :  { %2663 = vmatpush2.bf16.msra.mxu1 %v3511_v25 }
 0x632   :  { %2664 = vmatprep.subr.bf16.mxu1 %v3516_v48 }
 0x635   :  { %2665 = vmatpush2.bf16.msra.mxu1 %v3514_v49 }
 0x636   :  { %2666 = vmatprep.subr.bf16.mxu1 %v3519_v50 }
 0x639   :  { %2667 = vmatpush2.bf16.msra.mxu1 %v3517_v51 }
 0x63a   :  { %2668 = vmatprep.subr.bf16.mxu1 %v3522_v52 }
 0x63d   :  { %2669 = vmatpush2.bf16.msra.mxu1 %v3520_v53 }
 0x6c0   :  { %v2144_v30 = vpop.f32.mrf.mxu1 }
 0x6c1   :  { %v2145_v39 = vadd.f32 %v2144_v30, %v1945_v32 }
 0x6c2   :  { %v2146_v33 = vpop.f32.mrf.mxu1 }
 0x6c3   :  { %v2147_v36 = vadd.f32 %v2146_v33, %v1949_v31  ;;  %v2153_v45 = vmax.f32 %v2145_v39, 0.0 }
 0x6c4   :  { %v2148_v34 = vpop.f32.mrf.mxu1 }
 0x6c5   :  { %v2149_v38 = vadd.f32 %v2148_v34, %v1945_v32  ;;  %v2154_v43 = vmax.f32 %v2147_v36, 0.0 }
 0x6c6   :  { %v2150_v40 = vpop.f32.mrf.mxu1 }
 0x6c7   :  { %v2151_v41 = vadd.f32 %v2150_v40, %v1949_v31  ;;  %v2155_v42 = vmax.f32 %v2149_v38, 0.0 }
 0x6c9   :  { %v2156_v44 = vmax.f32 %v2151_v41, 0.0  ;;  %v2157_v47 = vpack.c.bf16 %v2155_v42, %v2153_v45 }
 0x6cb   :  { %v2158_v46 = vpack.c.bf16 %v2156_v44, %v2154_v43 }
 0x6cd   :  { %2406 = vmatprep.mubr.bf16.mxu0 %v2158_v46 }
 0x6ce   :  { %2407 = vmatmul.mubr.bf16.vlgmr.msra.gmra.mxu0 %v2157_v47 }
 0x78e   :  { %v2408_v58 = vpop.f32.mrf.mxu0 }
 0x78f   :  { %v2409_v1 = vadd.f32 %v2408_v58, %v2209_v60 }
 0x790   :  { %v2410_v61 = vpop.f32.mrf.mxu0 }
 0x791   :  { %v2411_v63 = vadd.f32 %v2410_v61, %v2213_v59  ;;  %v2417_v7 = vmax.f32 %v2409_v1, 0.0 }
 0x792   :  { %v2412_v62 = vpop.f32.mrf.mxu0 }
 0x793   :  { %v2413_v0 = vadd.f32 %v2412_v62, %v2209_v60  ;;  %v2418_v5 = vmax.f32 %v2411_v63, 0.0 }
 0x794   :  { %v2414_v2 = vpop.f32.mrf.mxu0 }
 0x795   :  { %v2415_v3 = vadd.f32 %v2414_v2, %v2213_v59  ;;  %v2419_v4 = vmax.f32 %v2413_v0, 0.0 }
 0x797   :  { %v2420_v6 = vmax.f32 %v2415_v3, 0.0  ;;  %v2421_v9 = vpack.c.bf16 %v2419_v4, %v2417_v7 }
 0x799   :  { %v2422_v8 = vpack.c.bf16 %v2420_v6, %v2418_v5 }
 0x79b   :  { %2670 = vmatprep.mubr.bf16.mxu1 %v2422_v8 }
 0x79c   :  { %2671 = vmatmul.mubr.bf16.vlgmr.msra.gmra.mxu1 %v2421_v9 }
 0x85c   :  { %v2672_v16 = vpop.f32.mrf.mxu1 }
 0x85d   :  { %v2673_v17 = vadd.f32 %v2672_v16, %v2473_v14 }
 0x85e   :  { %v2674_v18 = vpop.f32.mrf.mxu1 }
 0x85f   :  { %v2681_v19 = vmax.f32 %v2673_v17, 0.0  ;;  %v2675_v20 = vadd.f32 %v2674_v18, %v2477_v15 }
 0x860   :  { %v2676_v21 = vpop.f32.mrf.mxu1 }
 0x861   :  { %2685 = vst [vmem:[#allocation7] sm:$0xff] %v2681_v19  ;;  %v2682_v22 = vmax.f32 %v2675_v20, 0.0  ;;  %v2677_v23 = vadd.f32 %v2676_v21, %v2473_v14 }
 0x862   :  { %v2678_v24 = vpop.f32.mrf.mxu1 }
 0x863   :  { %2686 = vst [vmem:[#allocation7 + $0x8] sm:$0xff] %v2682_v22  ;;  %v2683_v25 = vmax.f32 %v2677_v23, 0.0  ;;  %v2679_v26 = vadd.f32 %v2678_v24, %v2477_v15 }
 0x865   :  { %2687 = vst [vmem:[#allocation7 + $0x10] sm:$0xff] %v2683_v25  ;;  %v2684_v35 = vmax.f32 %v2679_v26, 0.0 }
 0x867   :  { %2688 = vst [vmem:[#allocation7 + $0x18] sm:$0xff] %v2684_v35 }
 0x868   :  { %3574 = shalt.err (!%p3571_p0)
}
 0x869   :  { %2700 = dma.vmem_to_hbm [thread:$0]  %s2695_s19, 512, %s3708_s3, [#allocation4], %s3590_s15, %s3590_s15, %s3591_s16  }
 0x86a   :  { %3587 = dma.done.wait [#allocation4], 512  }
 0x86b   :  { %3588 = vsyncadd [#allocation4], 4294966784 }
 0x86c   :  { %2704 = vsyncpa [#allocation3], 1 }
 0x86d   :  { %2705 = vsyncpa [#allocation6], 1 }
 0x86e   :  { %2706 = vsyncpa [#allocation4], 1 }

</bundles_post_ra>
